<compile_context>
chip_gen: v7x
topology: tpu7x:2x2x1
jax: 0.10.0
libtpu: 0.0.40
codegen_flags: <defaults>
</compile_context>

<pallas_src>
import jax
import jax.numpy as jnp
from jax.experimental import pallas as pl
from jax.experimental.pallas import tpu as pltpu

_EPS = 1e-5
_LANE = 128
# Set to jnp.bfloat16 on v6e/v7x for ~2x MXU throughput (accumulation stays f32
# via preferred_element_type). Kept f32 so the self-test tolerance stays tight.
_MXU_DTYPE = jnp.float32


def _round_up(n, m):
    return ((n + m - 1) // m) * m


def _up_kernel(x1_ref, x2_ref, upw_ref, upb_ref,
               w1_ref, b1_ref, g1_ref, be1_ref,
               w2_ref, b2_ref, g2_ref, be2_ref,
               out_ref):
    f32 = jnp.float32
    N, L1, Cin_p = x1_ref.shape
    _, L2, half_p = x2_ref.shape
    Cout_p = out_ref.shape[-1]
    diffX = L2 - 2 * L1
    pad_l = diffX // 2
    pad_r = diffX - pad_l

    # ---- ConvTranspose1d(Cin -> half, k=2, stride=2): two matmuls (even/odd taps)
    x1f = x1_ref[...].reshape(N * L1, Cin_p).astype(_MXU_DTYPE)
    upw = upw_ref[...].astype(_MXU_DTYPE)
    upb = upb_ref[...]
    even = jnp.dot(x1f, upw[0], preferred_element_type=f32) + upb   # (N*L1, half_p)
    odd = jnp.dot(x1f, upw[1], preferred_element_type=f32) + upb    # (N*L1, half_p)

    # ---- interleave even/odd along length in registers (one stack + reshape)
    eo = jnp.stack([even, odd], axis=1)                             # (N*L1, 2, half_p)
    up = eo.reshape(N, 2 * L1, half_p)

    # ---- F.pad(diffX) + conv padding (2) in registers: only pad rows are zeroed
    up_p = jnp.concatenate(
        [jnp.zeros((N, 2 + pad_l, half_p), f32), up,
         jnp.zeros((N, 2 + pad_r, half_p), f32)], axis=1)           # (N, L2+4, half_p)
    zc = jnp.zeros((N, 2, half_p), f32)
    x2p = jnp.concatenate([zc, x2_ref[...], zc], axis=1)            # (N, L2+4, half_p)

    # ---- Conv1d #1 (k=5, pad=2) as one deep-K matmul via im2col over [x2 | up]
    taps = [x2p[:, k:k + L2, :] for k in range(5)] \
         + [up_p[:, k:k + L2, :] for k in range(5)]
    col = jnp.concatenate(taps, axis=-1).reshape(N * L2, 10 * half_p)
    acc = jnp.dot(col.astype(_MXU_DTYPE), w1_ref[...].astype(_MXU_DTYPE),
                  preferred_element_type=f32) + b1_ref[...]         # (N*L2, Cout_p)

    # ---- BatchNorm (training mode, biased) + ReLU, single-pass statistics
    inv_m = 1.0 / (N * L2)
    mu = jnp.sum(acc, axis=0, keepdims=True) * inv_m
    var = jnp.maximum(jnp.sum(acc * acc, axis=0, keepdims=True) * inv_m - mu * mu, 0.0)
    y = jnp.maximum((acc - mu) * jax.lax.rsqrt(var + _EPS) * g1_ref[...] + be1_ref[...],
                    0.0)

    # ---- Conv1d #2 (k=5, pad=2) as one deep-K matmul; intermediate stays resident
    y3 = y.reshape(N, L2, Cout_p)
    zc2 = jnp.zeros((N, 2, Cout_p), f32)
    yp = jnp.concatenate([zc2, y3, zc2], axis=1)                    # (N, L2+4, Cout_p)
    col2 = jnp.concatenate([yp[:, k:k + L2, :] for k in range(5)], axis=-1
                           ).reshape(N * L2, 5 * Cout_p)
    acc2 = jnp.dot(col2.astype(_MXU_DTYPE), w2_ref[...].astype(_MXU_DTYPE),
                   preferred_element_type=f32) + b2_ref[...]

    mu2 = jnp.sum(acc2, axis=0, keepdims=True) * inv_m
    var2 = jnp.maximum(jnp.sum(acc2 * acc2, axis=0, keepdims=True) * inv_m - mu2 * mu2,
                       0.0)
    z = jnp.maximum((acc2 - mu2) * jax.lax.rsqrt(var2 + _EPS) * g2_ref[...] + be2_ref[...],
                    0.0)

    # lane-dense output store (Cout_p is a multiple of 128)
    out_ref[...] = z.reshape(N, L2, Cout_p)


@jax.jit
def up_forward(x1_ncl, x2_ncl, params):
    """Forward pass of `Up`.  x1_ncl: (N, Cin, L1), x2_ncl: (N, Cin//2, L2)."""
    (up_w, up_b, w1, b1, g1, be1, w2, b2, g2, be2) = params

    N, Cin, L1 = x1_ncl.shape
    _, half, L2 = x2_ncl.shape
    Cout = w1.shape[0]
    Cin_p = _round_up(Cin, _LANE)
    half_p = _round_up(half, _LANE)
    Cout_p = _round_up(Cout, _LANE)
    f32 = jnp.float32

    # NCL -> NLC (channels last = lane axis), zero-pad channels to lane multiples
    x1 = jnp.pad(jnp.transpose(x1_ncl, (0, 2, 1)).astype(f32),
                 ((0, 0), (0, 0), (0, Cin_p - Cin)))
    x2 = jnp.pad(jnp.transpose(x2_ncl, (0, 2, 1)).astype(f32),
                 ((0, 0), (0, 0), (0, half_p - half)))

    # ConvTranspose weights: (Cin, half, 2) -> (2, Cin_p, half_p)
    upw = jnp.pad(jnp.transpose(up_w, (2, 0, 1)).astype(f32),
                  ((0, 0), (0, Cin_p - Cin), (0, half_p - half)))
    upb = jnp.pad(up_b.astype(f32), (0, half_p - half)).reshape(1, half_p)

    # Conv1 weights (Cout, Cin, 5) -> im2col layout (10*half_p, Cout_p):
    # tap blocks 0..4 pair with x2 channels, blocks 5..9 with upsampled-x1 channels.
    w1k = jnp.transpose(w1, (2, 1, 0)).astype(f32)                   # (5, Cin, Cout)
    w1_x2 = jnp.pad(w1k[:, :half, :], ((0, 0), (0, half_p - half), (0, Cout_p - Cout)))
    w1_up = jnp.pad(w1k[:, half:, :], ((0, 0), (0, half_p - half), (0, Cout_p - Cout)))
    w1flat = jnp.concatenate([w1_x2.reshape(5 * half_p, Cout_p),
                              w1_up.reshape(5 * half_p, Cout_p)], axis=0)

    # Conv2 weights (Cout, Cout, 5) -> (5*Cout_p, Cout_p)
    w2k = jnp.transpose(w2, (2, 1, 0)).astype(f32)                   # (5, Cout, Cout)
    w2flat = jnp.pad(w2k, ((0, 0), (0, Cout_p - Cout), (0, Cout_p - Cout))
                     ).reshape(5 * Cout_p, Cout_p)

    def _rowvec(v):  # zero-pad (keeps padded BN channels identically zero)
        return jnp.pad(v.astype(f32), (0, Cout_p - Cout)).reshape(1, Cout_p)

    b1r, g1r, be1r = _rowvec(b1), _rowvec(g1), _rowvec(be1)
    b2r, g2r, be2r = _rowvec(b2), _rowvec(g2), _rowvec(be2)

    out_nlc = pl.pallas_call(
        _up_kernel,
        out_shape=jax.ShapeDtypeStruct((N, L2, Cout_p), f32),
        compiler_params=pltpu.CompilerParams(vmem_limit_bytes=32 * 1024 * 1024),
    )(x1, x2, upw, upb, w1flat, b1r, g1r, be1r, w2flat, b2r, g2r, be2r)

    # strip channel padding, back to PyTorch's NCL layout
    return jnp.transpose(out_nlc[:, :, :Cout], (0, 2, 1))


def _reference_forward(x1_ncl, x2_ncl, params):
    """Pure-JAX reference mirroring the PyTorch module (training-mode BN)."""
    (up_w, up_b, w1, b1, g1, be1, w2, b2, g2, be2) = params
    x1 = jnp.transpose(x1_ncl, (0, 2, 1)).astype(jnp.float32)   # (N, L1, Cin)
    x2 = jnp.transpose(x2_ncl, (0, 2, 1)).astype(jnp.float32)   # (N, L2, half)
    N, L1, Cin = x1.shape
    _, L2, half = x2.shape

    upw = jnp.transpose(up_w, (2, 0, 1)).astype(jnp.float32)
    even = jnp.einsum("nli,io->nlo", x1, upw[0]) + up_b
    odd = jnp.einsum("nli,io->nlo", x1, upw[1]) + up_b
    up = jnp.stack([even, odd], axis=2).reshape(N, 2 * L1, half)
    diffX = L2 - 2 * L1
    up = jnp.pad(up, ((0, 0), (diffX // 2, diffX - diffX // 2), (0, 0)))
    x = jnp.concatenate([x2, up], axis=-1)

    def conv_bn_relu(x, w, b, g, be):
        Cout = w.shape[0]
        L = x.shape[1]
        wk = jnp.transpose(w, (2, 1, 0)).astype(jnp.float32)    # (5, Cin, Cout)
        xp = jnp.pad(x, ((0, 0), (2, 2), (0, 0)))
        out = jnp.zeros((x.shape[0], L, Cout), jnp.float32) + b
        for k in range(5):
            out = out + jnp.einsum("nlc,co->nlo", xp[:, k:k + L, :], wk[k])
        mu = out.mean(axis=(0, 1))
        var = ((out - mu) ** 2).mean(axis=(0, 1))
        y = (out - mu) / jnp.sqrt(var + _EPS) * g + be
        return jnp.maximum(y, 0.0)

    y = conv_bn_relu(x, w1, b1, g1, be1)
    z = conv_bn_relu(y, w2, b2, g2, be2)
    return jnp.transpose(z, (0, 2, 1))


def _init_params(key, in_channels, out_channels):
    half = in_channels // 2
    ks = jax.random.split(key, 6)
    up_w = 0.1 * jax.random.normal(ks[0], (in_channels, half, 2), jnp.float32)
    up_b = 0.1 * jax.random.normal(ks[1], (half,), jnp.float32)
    w1 = 0.1 * jax.random.normal(ks[2], (out_channels, in_channels, 5), jnp.float32)
    b1 = 0.1 * jax.random.normal(ks[3], (out_channels,), jnp.float32)
    w2 = 0.1 * jax.random.normal(ks[4], (out_channels, out_channels, 5), jnp.float32)
    b2 = 0.1 * jax.random.normal(ks[5], (out_channels,), jnp.float32)
    # BatchNorm affine params at PyTorch init: weight=1, bias=0
    g1 = jnp.ones((out_channels,), jnp.float32)
    be1 = jnp.zeros((out_channels,), jnp.float32)
    g2 = jnp.ones((out_channels,), jnp.float32)
    be2 = jnp.zeros((out_channels,), jnp.float32)
    return (up_w, up_b, w1, b1, g1, be1, w2, b2, g2, be2)


if __name__ == "__main__":
    in_channels, out_channels = 8, 4
    N, L1, L2 = 2, 8, 18          # upsampled length = 16, diffX = 2 -> exercises F.pad

    key = jax.random.PRNGKey(0)
    kx1, kx2, kp = jax.random.split(key, 3)
    x1 = jax.random.normal(kx1, (N, in_channels, L1), jnp.float32)       # PyTorch NCL
    x2 = jax.random.normal(kx2, (N, in_channels // 2, L2), jnp.float32)  # PyTorch NCL
    params = _init_params(kp, in_channels, out_channels)

    out = jax.block_until_ready(up_forward(x1, x2, params))

    ref = _reference_forward(x1, x2, params)
    assert out.shape == (N, out_channels, L2)
    assert jnp.allclose(out, ref, atol=1e-3, rtol=1e-3), "mismatch vs. reference"

    print("KERNEL_OK")
</pallas_src>

<mosaic_0001>
module attributes {stable_mosaic.version = 11 : i64} {
  func.func @_up_kernel(%arg0: memref<2x8x128xf32, #tpu.memory_space<vmem>>, %arg1: memref<2x18x128xf32, #tpu.memory_space<vmem>>, %arg2: memref<2x128x128xf32, #tpu.memory_space<vmem>>, %arg3: memref<1x128xf32, #tpu.memory_space<vmem>>, %arg4: memref<1280x128xf32, #tpu.memory_space<vmem>>, %arg5: memref<1x128xf32, #tpu.memory_space<vmem>>, %arg6: memref<1x128xf32, #tpu.memory_space<vmem>>, %arg7: memref<1x128xf32, #tpu.memory_space<vmem>>, %arg8: memref<640x128xf32, #tpu.memory_space<vmem>>, %arg9: memref<1x128xf32, #tpu.memory_space<vmem>>, %arg10: memref<1x128xf32, #tpu.memory_space<vmem>>, %arg11: memref<1x128xf32, #tpu.memory_space<vmem>>, %arg12: memref<2x18x128xf32, #tpu.memory_space<vmem>>) attributes {dimension_semantics = [], scalar_prefetch = 0 : i64, scratch_operands = 0 : i64, tpu.core_type = #tpu.core_type<tc>} {
    %c0 = arith.constant 0 : index
    %c0_0 = arith.constant 0 : index
    %c0_1 = arith.constant 0 : index
    %0 = vector.load %arg0[%c0, %c0_0, %c0_1] : memref<2x8x128xf32, #tpu.memory_space<vmem>>, vector<2x8x128xf32>
    %1 = vector.shape_cast %0 : vector<2x8x128xf32> to vector<16x128xf32>
    %c0_2 = arith.constant 0 : index
    %c0_3 = arith.constant 0 : index
    %c0_4 = arith.constant 0 : index
    %2 = vector.load %arg2[%c0_2, %c0_3, %c0_4] : memref<2x128x128xf32, #tpu.memory_space<vmem>>, vector<2x128x128xf32>
    %c0_5 = arith.constant 0 : index
    %c0_6 = arith.constant 0 : index
    %3 = vector.load %arg3[%c0_5, %c0_6] : memref<1x128xf32, #tpu.memory_space<vmem>>, vector<1x128xf32>
    %4 = vector.extract_strided_slice %2 {offsets = [0, 0, 0], sizes = [1, 128, 128], strides = [1, 1, 1]} : vector<2x128x128xf32> to vector<1x128x128xf32>
    %5 = vector.shape_cast %4 : vector<1x128x128xf32> to vector<128x128xf32>
    %cst = arith.constant dense<0.000000e+00> : vector<16x128xf32>
    %6 = tpu.matmul %1, %5, %cst {dimension_numbers = #tpu.dot_dimension_numbers<[1], [0], [0], [1], [0, 0, 1, 1], [], []>} : vector<16x128xf32>, vector<128x128xf32>, vector<16x128xf32> -> vector<16x128xf32>
    %7 = vector.broadcast %3 : vector<1x128xf32> to vector<16x128xf32>
    %8 = arith.addf %6, %7 : vector<16x128xf32>
    %9 = vector.extract_strided_slice %2 {offsets = [1, 0, 0], sizes = [1, 128, 128], strides = [1, 1, 1]} : vector<2x128x128xf32> to vector<1x128x128xf32>
    %10 = vector.shape_cast %9 : vector<1x128x128xf32> to vector<128x128xf32>
    %cst_7 = arith.constant dense<0.000000e+00> : vector<16x128xf32>
    %11 = tpu.matmul %1, %10, %cst_7 {dimension_numbers = #tpu.dot_dimension_numbers<[1], [0], [0], [1], [0, 0, 1, 1], [], []>} : vector<16x128xf32>, vector<128x128xf32>, vector<16x128xf32> -> vector<16x128xf32>
    %12 = vector.broadcast %3 : vector<1x128xf32> to vector<16x128xf32>
    %13 = arith.addf %11, %12 : vector<16x128xf32>
    %14 = vector.shape_cast %8 : vector<16x128xf32> to vector<16x1x128xf32>
    %15 = vector.shape_cast %13 : vector<16x128xf32> to vector<16x1x128xf32>
    %16 = tpu.concatenate %14, %15 in 1 : vector<16x1x128xf32>, vector<16x1x128xf32> -> vector<16x2x128xf32>
    %17 = vector.shape_cast %16 : vector<16x2x128xf32> to vector<2x16x128xf32>
    %cst_8 = arith.constant 0.000000e+00 : f32
    %18 = vector.broadcast %cst_8 : f32 to vector<2x3x128xf32>
    %cst_9 = arith.constant 0.000000e+00 : f32
    %19 = vector.broadcast %cst_9 : f32 to vector<2x3x128xf32>
    %20 = tpu.concatenate %18, %17, %19 in 1 : vector<2x3x128xf32>, vector<2x16x128xf32>, vector<2x3x128xf32> -> vector<2x22x128xf32>
    %cst_10 = arith.constant 0.000000e+00 : f32
    %21 = vector.broadcast %cst_10 : f32 to vector<2x2x128xf32>
    %c0_11 = arith.constant 0 : index
    %c0_12 = arith.constant 0 : index
    %c0_13 = arith.constant 0 : index
    %22 = vector.load %arg1[%c0_11, %c0_12, %c0_13] : memref<2x18x128xf32, #tpu.memory_space<vmem>>, vector<2x18x128xf32>
    %23 = tpu.concatenate %21, %22, %21 in 1 : vector<2x2x128xf32>, vector<2x18x128xf32>, vector<2x2x128xf32> -> vector<2x22x128xf32>
    %24 = vector.extract_strided_slice %23 {offsets = [0, 0, 0], sizes = [2, 18, 128], strides = [1, 1, 1]} : vector<2x22x128xf32> to vector<2x18x128xf32>
    %25 = vector.extract_strided_slice %23 {offsets = [0, 1, 0], sizes = [2, 18, 128], strides = [1, 1, 1]} : vector<2x22x128xf32> to vector<2x18x128xf32>
    %26 = vector.extract_strided_slice %23 {offsets = [0, 2, 0], sizes = [2, 18, 128], strides = [1, 1, 1]} : vector<2x22x128xf32> to vector<2x18x128xf32>
    %27 = vector.extract_strided_slice %23 {offsets = [0, 3, 0], sizes = [2, 18, 128], strides = [1, 1, 1]} : vector<2x22x128xf32> to vector<2x18x128xf32>
    %28 = vector.extract_strided_slice %23 {offsets = [0, 4, 0], sizes = [2, 18, 128], strides = [1, 1, 1]} : vector<2x22x128xf32> to vector<2x18x128xf32>
    %29 = vector.extract_strided_slice %20 {offsets = [0, 0, 0], sizes = [2, 18, 128], strides = [1, 1, 1]} : vector<2x22x128xf32> to vector<2x18x128xf32>
    %30 = vector.extract_strided_slice %20 {offsets = [0, 1, 0], sizes = [2, 18, 128], strides = [1, 1, 1]} : vector<2x22x128xf32> to vector<2x18x128xf32>
    %31 = vector.extract_strided_slice %20 {offsets = [0, 2, 0], sizes = [2, 18, 128], strides = [1, 1, 1]} : vector<2x22x128xf32> to vector<2x18x128xf32>
    %32 = vector.extract_strided_slice %20 {offsets = [0, 3, 0], sizes = [2, 18, 128], strides = [1, 1, 1]} : vector<2x22x128xf32> to vector<2x18x128xf32>
    %33 = vector.extract_strided_slice %20 {offsets = [0, 4, 0], sizes = [2, 18, 128], strides = [1, 1, 1]} : vector<2x22x128xf32> to vector<2x18x128xf32>
    %34 = tpu.concatenate %24, %25, %26, %27, %28, %29, %30, %31, %32, %33 in 2 : vector<2x18x128xf32>, vector<2x18x128xf32>, vector<2x18x128xf32>, vector<2x18x128xf32>, vector<2x18x128xf32>, vector<2x18x128xf32>, vector<2x18x128xf32>, vector<2x18x128xf32>, vector<2x18x128xf32>, vector<2x18x128xf32> -> vector<2x18x1280xf32>
    %35 = vector.shape_cast %34 : vector<2x18x1280xf32> to vector<36x1280xf32>
    %c0_14 = arith.constant 0 : index
    %c0_15 = arith.constant 0 : index
    %36 = vector.load %arg4[%c0_14, %c0_15] : memref<1280x128xf32, #tpu.memory_space<vmem>>, vector<1280x128xf32>
    %cst_16 = arith.constant dense<0.000000e+00> : vector<36x128xf32>
    %37 = tpu.matmul %35, %36, %cst_16 {dimension_numbers = #tpu.dot_dimension_numbers<[1], [0], [0], [1], [0, 0, 1, 1], [], []>} : vector<36x1280xf32>, vector<1280x128xf32>, vector<36x128xf32> -> vector<36x128xf32>
    %c0_17 = arith.constant 0 : index
    %c0_18 = arith.constant 0 : index
    %38 = vector.load %arg5[%c0_17, %c0_18] : memref<1x128xf32, #tpu.memory_space<vmem>>, vector<1x128xf32>
    %39 = vector.broadcast %38 : vector<1x128xf32> to vector<36x128xf32>
    %40 = arith.addf %37, %39 : vector<36x128xf32>
    %cst_19 = arith.constant dense<0.000000e+00> : vector<128xf32>
    %41 = vector.multi_reduction <add>, %40, %cst_19 [0] : vector<36x128xf32> to vector<128xf32>
    %42 = vector.shape_cast %41 : vector<128xf32> to vector<1x128xf32>
    %cst_20 = arith.constant 0.027777778 : f32
    %43 = vector.broadcast %cst_20 : f32 to vector<1x128xf32>
    %44 = arith.mulf %42, %43 : vector<1x128xf32>
    %45 = arith.mulf %40, %40 : vector<36x128xf32>
    %cst_21 = arith.constant dense<0.000000e+00> : vector<128xf32>
    %46 = vector.multi_reduction <add>, %45, %cst_21 [0] : vector<36x128xf32> to vector<128xf32>
    %47 = vector.shape_cast %46 : vector<128xf32> to vector<1x128xf32>
    %cst_22 = arith.constant 0.027777778 : f32
    %48 = vector.broadcast %cst_22 : f32 to vector<1x128xf32>
    %49 = arith.mulf %47, %48 : vector<1x128xf32>
    %50 = arith.mulf %44, %44 : vector<1x128xf32>
    %51 = arith.subf %49, %50 : vector<1x128xf32>
    %cst_23 = arith.constant 0.000000e+00 : f32
    %52 = vector.broadcast %cst_23 : f32 to vector<1x128xf32>
    %53 = arith.maximumf %51, %52 : vector<1x128xf32>
    %54 = vector.broadcast %44 : vector<1x128xf32> to vector<36x128xf32>
    %55 = arith.subf %40, %54 : vector<36x128xf32>
    %cst_24 = arith.constant 9.99999974E-6 : f32
    %56 = vector.broadcast %cst_24 : f32 to vector<1x128xf32>
    %57 = arith.addf %53, %56 : vector<1x128xf32>
    %58 = math.rsqrt %57 : vector<1x128xf32>
    %59 = vector.broadcast %58 : vector<1x128xf32> to vector<36x128xf32>
    %60 = arith.mulf %55, %59 : vector<36x128xf32>
    %c0_25 = arith.constant 0 : index
    %c0_26 = arith.constant 0 : index
    %61 = vector.load %arg6[%c0_25, %c0_26] : memref<1x128xf32, #tpu.memory_space<vmem>>, vector<1x128xf32>
    %62 = vector.broadcast %61 : vector<1x128xf32> to vector<36x128xf32>
    %63 = arith.mulf %60, %62 : vector<36x128xf32>
    %c0_27 = arith.constant 0 : index
    %c0_28 = arith.constant 0 : index
    %64 = vector.load %arg7[%c0_27, %c0_28] : memref<1x128xf32, #tpu.memory_space<vmem>>, vector<1x128xf32>
    %65 = vector.broadcast %64 : vector<1x128xf32> to vector<36x128xf32>
    %66 = arith.addf %63, %65 : vector<36x128xf32>
    %cst_29 = arith.constant 0.000000e+00 : f32
    %67 = vector.broadcast %cst_29 : f32 to vector<36x128xf32>
    %68 = arith.maximumf %66, %67 : vector<36x128xf32>
    %69 = vector.shape_cast %68 : vector<36x128xf32> to vector<2x18x128xf32>
    %cst_30 = arith.constant 0.000000e+00 : f32
    %70 = vector.broadcast %cst_30 : f32 to vector<2x2x128xf32>
    %71 = tpu.concatenate %70, %69, %70 in 1 : vector<2x2x128xf32>, vector<2x18x128xf32>, vector<2x2x128xf32> -> vector<2x22x128xf32>
    %72 = vector.extract_strided_slice %71 {offsets = [0, 0, 0], sizes = [2, 18, 128], strides = [1, 1, 1]} : vector<2x22x128xf32> to vector<2x18x128xf32>
    %73 = vector.extract_strided_slice %71 {offsets = [0, 1, 0], sizes = [2, 18, 128], strides = [1, 1, 1]} : vector<2x22x128xf32> to vector<2x18x128xf32>
    %74 = vector.extract_strided_slice %71 {offsets = [0, 2, 0], sizes = [2, 18, 128], strides = [1, 1, 1]} : vector<2x22x128xf32> to vector<2x18x128xf32>
    %75 = vector.extract_strided_slice %71 {offsets = [0, 3, 0], sizes = [2, 18, 128], strides = [1, 1, 1]} : vector<2x22x128xf32> to vector<2x18x128xf32>
    %76 = vector.extract_strided_slice %71 {offsets = [0, 4, 0], sizes = [2, 18, 128], strides = [1, 1, 1]} : vector<2x22x128xf32> to vector<2x18x128xf32>
    %77 = tpu.concatenate %72, %73, %74, %75, %76 in 2 : vector<2x18x128xf32>, vector<2x18x128xf32>, vector<2x18x128xf32>, vector<2x18x128xf32>, vector<2x18x128xf32> -> vector<2x18x640xf32>
    %78 = vector.shape_cast %77 : vector<2x18x640xf32> to vector<36x640xf32>
    %c0_31 = arith.constant 0 : index
    %c0_32 = arith.constant 0 : index
    %79 = vector.load %arg8[%c0_31, %c0_32] : memref<640x128xf32, #tpu.memory_space<vmem>>, vector<640x128xf32>
    %cst_33 = arith.constant dense<0.000000e+00> : vector<36x128xf32>
    %80 = tpu.matmul %78, %79, %cst_33 {dimension_numbers = #tpu.dot_dimension_numbers<[1], [0], [0], [1], [0, 0, 1, 1], [], []>} : vector<36x640xf32>, vector<640x128xf32>, vector<36x128xf32> -> vector<36x128xf32>
    %c0_34 = arith.constant 0 : index
    %c0_35 = arith.constant 0 : index
    %81 = vector.load %arg9[%c0_34, %c0_35] : memref<1x128xf32, #tpu.memory_space<vmem>>, vector<1x128xf32>
    %82 = vector.broadcast %81 : vector<1x128xf32> to vector<36x128xf32>
    %83 = arith.addf %80, %82 : vector<36x128xf32>
    %cst_36 = arith.constant dense<0.000000e+00> : vector<128xf32>
    %84 = vector.multi_reduction <add>, %83, %cst_36 [0] : vector<36x128xf32> to vector<128xf32>
    %85 = vector.shape_cast %84 : vector<128xf32> to vector<1x128xf32>
    %cst_37 = arith.constant 0.027777778 : f32
    %86 = vector.broadcast %cst_37 : f32 to vector<1x128xf32>
    %87 = arith.mulf %85, %86 : vector<1x128xf32>
    %88 = arith.mulf %83, %83 : vector<36x128xf32>
    %cst_38 = arith.constant dense<0.000000e+00> : vector<128xf32>
    %89 = vector.multi_reduction <add>, %88, %cst_38 [0] : vector<36x128xf32> to vector<128xf32>
    %90 = vector.shape_cast %89 : vector<128xf32> to vector<1x128xf32>
    %cst_39 = arith.constant 0.027777778 : f32
    %91 = vector.broadcast %cst_39 : f32 to vector<1x128xf32>
    %92 = arith.mulf %90, %91 : vector<1x128xf32>
    %93 = arith.mulf %87, %87 : vector<1x128xf32>
    %94 = arith.subf %92, %93 : vector<1x128xf32>
    %cst_40 = arith.constant 0.000000e+00 : f32
    %95 = vector.broadcast %cst_40 : f32 to vector<1x128xf32>
    %96 = arith.maximumf %94, %95 : vector<1x128xf32>
    %97 = vector.broadcast %87 : vector<1x128xf32> to vector<36x128xf32>
    %98 = arith.subf %83, %97 : vector<36x128xf32>
    %cst_41 = arith.constant 9.99999974E-6 : f32
    %99 = vector.broadcast %cst_41 : f32 to vector<1x128xf32>
    %100 = arith.addf %96, %99 : vector<1x128xf32>
    %101 = math.rsqrt %100 : vector<1x128xf32>
    %102 = vector.broadcast %101 : vector<1x128xf32> to vector<36x128xf32>
    %103 = arith.mulf %98, %102 : vector<36x128xf32>
    %c0_42 = arith.constant 0 : index
    %c0_43 = arith.constant 0 : index
    %104 = vector.load %arg10[%c0_42, %c0_43] : memref<1x128xf32, #tpu.memory_space<vmem>>, vector<1x128xf32>
    %105 = vector.broadcast %104 : vector<1x128xf32> to vector<36x128xf32>
    %106 = arith.mulf %103, %105 : vector<36x128xf32>
    %c0_44 = arith.constant 0 : index
    %c0_45 = arith.constant 0 : index
    %107 = vector.load %arg11[%c0_44, %c0_45] : memref<1x128xf32, #tpu.memory_space<vmem>>, vector<1x128xf32>
    %108 = vector.broadcast %107 : vector<1x128xf32> to vector<36x128xf32>
    %109 = arith.addf %106, %108 : vector<36x128xf32>
    %cst_46 = arith.constant 0.000000e+00 : f32
    %110 = vector.broadcast %cst_46 : f32 to vector<36x128xf32>
    %111 = arith.maximumf %109, %110 : vector<36x128xf32>
    %112 = vector.shape_cast %111 : vector<36x128xf32> to vector<2x18x128xf32>
    %c0_47 = arith.constant 0 : index
    %c0_48 = arith.constant 0 : index
    %c0_49 = arith.constant 0 : index
    %113 = vector.load %arg12[%c0_47, %c0_48, %c0_49] : memref<2x18x128xf32, #tpu.memory_space<vmem>>, vector<2x18x128xf32>
    tpu.vector_store %arg12[%c0_47, %c0_48, %c0_49], %112 {strides = array<i32>} : memref<2x18x128xf32, #tpu.memory_space<vmem>>, vector<2x18x128xf32>,
    return
  }
}

</mosaic_0001>

<bundles_post_ra>
// kernel: up_forward.1
= control target key start
LH: loop header
LB: loop body
LE: loop exit
PB: predicated region body
PF: predicated region fallthrough
CT: control target
= control target key end

     0   :  { %v238_v53 = vlaneseq  ;;  %v4571_v54 = vmov 1983009808   ;;  %vm656_vm0 = vcmask 1041408   ;;  %vm680_vm1 = vcmask 1046528   ;;  %s6366_s2 = inlined_call_operand.vmem [shape: f32[2,128,128], index: 2, kind: input, shape index: {}]   ;;  %s6367_s0 = inlined_call_operand.vmem [shape: f32[2,8,128], index: 0, kind: input, shape index: {}]   ;;  %s6368_s4 = inlined_call_operand.vmem [shape: f32[1280,128], index: 4, kind: input, shape index: {}]   ;;  %s6369_s1 = inlined_call_operand.vmem [shape: f32[2,18,128], index: 1, kind: input, shape index: {}]   ;;  %s6370_s3 = inlined_call_operand.vmem [shape: f32[1,128], index: 3, kind: input, shape index: {}]   ;;  %s6371_s5 = inlined_call_operand.vmem [shape: f32[1,128], index: 5, kind: input, shape index: {}]   ;;  %s6372_s8 = inlined_call_operand.vmem [shape: f32[640,128], index: 8, kind: input, shape index: {}]   ;;  %s6373_s6 = inlined_call_operand.vmem [shape: f32[1,128], index: 6, kind: input, shape index: {}]   ;;  %s6374_s7 = inlined_call_operand.vmem [shape: f32[1,128], index: 7, kind: input, shape index: {}]   ;;  %s6375_s9 = inlined_call_operand.vmem [shape: f32[1,128], index: 9, kind: input, shape index: {}]   ;;  %s6376_s10 = inlined_call_operand.vmem [shape: f32[1,128], index: 10, kind: input, shape index: {}]   ;;  %s6377_s11 = inlined_call_operand.vmem [shape: f32[1,128], index: 11, kind: input, shape index: {}]   ;;  %s6378_s12 = inlined_call_operand.vmem [shape: f32[2,18,128], index: 12, kind: output, shape index: {}]  }
   0x1   :  { %v59_v0 = vld [vmem:[%s6366_s2 + $0x80] sm:$0xff]  ;;  %v60_v1 = vld [vmem:[%s6366_s2 + $0x88] sm:$0xff]  ;;  %v61_v5 = vld [vmem:[%s6366_s2 + $0x90] sm:$0xff]  ;;  %v564_v55 = vunpack.c.l.s4 %v4571_v54  ;;  %vm691_vm2 = vcmask 1045504   ;;  %vm702_vm3 = vcmask 1044480   ;;  %vm673_vm4 = vcmask 1043456  }
   0x2   :  { %v43_v2 = vld [vmem:[%s6366_s2] sm:$0xff]  ;;  %v4282_v3 = vpack.c.bf16 %v60_v1, %v59_v0  ;;  %v44_v4 = vld [vmem:[%s6366_s2 + $0x8] sm:$0xff]  ;;  %v62_v6 = vld [vmem:[%s6366_s2 + $0x98] sm:$0xff]  ;;  %vm528_vm5 = vcmask 1040384   ;;  %vm629_vm6 = vcmask 1042432   ;;  %vm4574_vm7 = vmmov 0  }
   0x3   :  { %v4250_v7 = vpack.c.bf16 %v44_v4, %v43_v2  ;;  %v4286_v8 = vpack.c.bf16 %v62_v6, %v61_v5  ;;  %v45_v9 = vld [vmem:[%s6366_s2 + $0x10] sm:$0xff]  ;;  %v46_v10 = vld [vmem:[%s6366_s2 + $0x18] sm:$0xff]  ;;  %v63_v11 = vld [vmem:[%s6366_s2 + $0xa0] sm:$0xff]  ;;  %v4779_v4 = vshrl.u32 %v238_v53, 7  ;;  %v565_v5 = vunpack.c.0.s8 %v564_v55 }
   0x4   :  { %4283 = vmatprep.subr.bf16.mxu1 %v4282_v3  ;;  %v4254_v12 = vpack.c.bf16 %v46_v10, %v45_v9  ;;  %v64_v13 = vld [vmem:[%s6366_s2 + $0xa8] sm:$0xff]  ;;  %v47_v14 = vld [vmem:[%s6366_s2 + $0x20] sm:$0xff]  ;;  %v65_v18 = vld [vmem:[%s6366_s2 + $0xb0] sm:$0xff] }
   0x5   :  { %v48_v15 = vld [vmem:[%s6366_s2 + $0x28] sm:$0xff]  ;;  %4251 = vmatprep.subr.bf16.mxu0 %v4250_v7  ;;  %4285 = vmatpush3.bf16.msra.mxu1 %v4282_v3  ;;  %v4290_v16 = vpack.c.bf16 %v64_v13, %v63_v11  ;;  %v66_v19 = vld [vmem:[%s6366_s2 + $0xb8] sm:$0xff]  ;;  %v49_v20 = vld [vmem:[%s6366_s2 + $0x30] sm:$0xff] }
   0x6   :  { %4253 = vmatpush3.bf16.msra.mxu0 %v4250_v7  ;;  %4287 = vmatprep.subr.bf16.mxu1 %v4286_v8  ;;  %v4258_v17 = vpack.c.bf16 %v48_v15, %v47_v14  ;;  %v50_v21 = vld [vmem:[%s6366_s2 + $0x38] sm:$0xff]  ;;  %v4294_v22 = vpack.c.bf16 %v66_v19, %v65_v18  ;;  %v67_v24 = vld [vmem:[%s6366_s2 + $0xc0] sm:$0xff]  ;;  %v68_v25 = vld [vmem:[%s6366_s2 + $0xc8] sm:$0xff] }
   0x7   :  { %4255 = vmatprep.subr.bf16.mxu0 %v4254_v12  ;;  %v4262_v23 = vpack.c.bf16 %v50_v21, %v49_v20  ;;  %v41_v26 = vld [vmem:[%s6367_s0] sm:$0xff]  ;;  %v52_v28 = vld [vmem:[%s6366_s2 + $0x48] sm:$0xff]  ;;  %v4298_v29 = vpack.c.bf16 %v68_v25, %v67_v24  ;;  %v69_v31 = vld [vmem:[%s6366_s2 + $0xd0] sm:$0xff] }
   0x8   :  { %v51_v27 = vld [vmem:[%s6366_s2 + $0x40] sm:$0xff]  ;;  %4200 = vmatprep.mubr.f32.mxu1 %v41_v26  ;;  %4165 = vmatprep.mubr.f32.mxu0 %v41_v26  ;;  %v70_v32 = vld [vmem:[%s6366_s2 + $0xd8] sm:$0xff]  ;;  %v53_v33 = vld [vmem:[%s6366_s2 + $0x50] sm:$0xff] }
   0x9   :  { %4289 = vmatpush3.bf16.msra.mxu1 %v4286_v8  ;;  %v4266_v30 = vpack.c.bf16 %v52_v28, %v51_v27  ;;  %v54_v34 = vld [vmem:[%s6366_s2 + $0x58] sm:$0xff]  ;;  %v4302_v35 = vpack.c.bf16 %v70_v32, %v69_v31  ;;  %v71_v37 = vld [vmem:[%s6366_s2 + $0xe0] sm:$0xff]  ;;  %v72_v38 = vld [vmem:[%s6366_s2 + $0xe8] sm:$0xff]  ;;  %v4837_v32 = vsub.s32 %v565_v5, %v4779_v4 }
   0xa   :  { %4257 = vmatpush3.bf16.msra.mxu0 %v4254_v12  ;;  %4291 = vmatprep.subr.bf16.mxu1 %v4290_v16  ;;  %v4270_v36 = vpack.c.bf16 %v54_v34, %v53_v33  ;;  %v55_v39 = vld [vmem:[%s6366_s2 + $0x60] sm:$0xff]  ;;  %v56_v40 = vld [vmem:[%s6366_s2 + $0x68] sm:$0xff]  ;;  %v4306_v41 = vpack.c.bf16 %v72_v38, %v71_v37  ;;  %v73_v43 = vld [vmem:[%s6366_s2 + $0xf0] sm:$0xff] }
   0xb   :  { %4259 = vmatprep.subr.bf16.mxu0 %v4258_v17  ;;  %v4274_v42 = vpack.c.bf16 %v56_v40, %v55_v39  ;;  %v74_v44 = vld [vmem:[%s6366_s2 + $0xf8] sm:$0xff]  ;;  %v57_v45 = vld [vmem:[%s6366_s2 + $0x70] sm:$0xff]  ;;  %v1259_v49 = vld [vmem:[%s6368_s4 + $0x180] sm:$0xff] }
   0xc   :  { %v58_v46 = vld [vmem:[%s6366_s2 + $0x78] sm:$0xff]  ;;  %v4310_v47 = vpack.c.bf16 %v74_v44, %v73_v43  ;;  %v1260_v50 = vld [vmem:[%s6368_s4 + $0x188] sm:$0xff]  ;;  %v1227_v51 = vld [vmem:[%s6368_s4 + $0x80] sm:$0xff] }
   0xd   :  { %4293 = vmatpush3.bf16.msra.mxu1 %v4290_v16  ;;  %v4278_v48 = vpack.c.bf16 %v58_v46, %v57_v45  ;;  %v1228_v52 = vld [vmem:[%s6368_s4 + $0x88] sm:$0xff]  ;;  %v1211_v56 = vld [vmem:[%s6368_s4] sm:$0xff]  ;;  %v4346_v57 = vpack.c.bf16 %v1260_v50, %v1259_v49  ;;  %v1261_v62 = vld [vmem:[%s6368_s4 + $0x190] sm:$0xff] }
   0xe   :  { %4261 = vmatpush3.bf16.msra.mxu0 %v4258_v17  ;;  %4295 = vmatprep.subr.bf16.mxu1 %v4294_v22  ;;  %v1243_v58 = vld [vmem:[%s6368_s4 + $0x100] sm:$0xff]  ;;  %v1244_v59 = vld [vmem:[%s6368_s4 + $0x108] sm:$0xff]  ;;  %v4314_v60 = vpack.c.bf16 %v1228_v52, %v1227_v51  ;;  %v1262_v63 = vld [vmem:[%s6368_s4 + $0x198] sm:$0xff] }
   0xf   :  { %4263 = vmatprep.subr.bf16.mxu0 %v4262_v23  ;;  %v1212_v61 = vld [vmem:[%s6368_s4 + $0x8] sm:$0xff]  ;;  %v1229_v0 = vld [vmem:[%s6368_s4 + $0x90] sm:$0xff]  ;;  %v1230_v1 = vld [vmem:[%s6368_s4 + $0x98] sm:$0xff]  ;;  %v4348_v3 = vpack.c.bf16 %v1244_v59, %v1243_v58  ;;  %v4350_v10 = vpack.c.bf16 %v1262_v63, %v1261_v62 }
  0x10   :  { %v42_v2 = vld [vmem:[%s6367_s0 + $0x8] sm:$0xff]  ;;  %v644_v6 = vld [vmem:[%s6369_s1] sm:$0xff]  ;;  %v4316_v8 = vpack.c.bf16 %v1212_v61, %v1211_v56  ;;  %v1213_v9 = vld [vmem:[%s6368_s4 + $0x10] sm:$0xff]  ;;  %v4318_v15 = vpack.c.bf16 %v1230_v1, %v1229_v0 }
  0x11   :  { %4297 = vmatpush3.bf16.msra.mxu1 %v4294_v22  ;;  %v4787_v7 = vld [vmem:[%s6369_s1 + $0x8] sm:$0xff]  ;;  %v1245_v11 = vld [vmem:[%s6368_s4 + $0x110] sm:$0xff]  ;;  %v1246_v12 = vld [vmem:[%s6368_s4 + $0x118] sm:$0xff]  ;;  %v657_v13 = vrot.slane %v644_v6, 6 }
  0x12   :  { %4265 = vmatpush3.bf16.msra.mxu0 %v4262_v23  ;;  %4299 = vmatprep.subr.bf16.mxu1 %v4298_v29  ;;  %v658_v14 = vrot.slane %v4787_v7, 6  ;;  %v1214_v16 = vld [vmem:[%s6368_s4 + $0x18] sm:$0xff]  ;;  %v1263_v17 = vld [vmem:[%s6368_s4 + $0x1a0] sm:$0xff]  ;;  %v1264_v18 = vld [vmem:[%s6368_s4 + $0x1a8] sm:$0xff]  ;;  %v4352_v23 = vpack.c.bf16 %v1246_v12, %v1245_v11 }
  0x13   :  { %4267 = vmatprep.subr.bf16.mxu0 %v4266_v30  ;;  %v1231_v19 = vld [vmem:[%s6368_s4 + $0xa0] sm:$0xff]  ;;  %v1232_v20 = vld [vmem:[%s6368_s4 + $0xa8] sm:$0xff]  ;;  %v4820_v22 = vsel %vm656_vm0, 0.0, %v657_v13  ;;  %v4320_v27 = vpack.c.bf16 %v1214_v16, %v1213_v9  ;;  %v1265_v34 = vld [vmem:[%s6368_s4 + $0x1b0] sm:$0xff] }
  0x14   :  { %v4817_v21 = vsel %vm656_vm0, %v657_v13, %v658_v14  ;;  %v1215_v24 = vld [vmem:[%s6368_s4 + $0x20] sm:$0xff]  ;;  %v681_v25 = vrot.slane %v4820_v22, 1  ;;  %v1216_v28 = vld [vmem:[%s6368_s4 + $0x28] sm:$0xff]  ;;  %v4322_v33 = vpack.c.bf16 %v1232_v20, %v1231_v19  ;;  %v1233_v37 = vld [vmem:[%s6368_s4 + $0xb0] sm:$0xff] }
  0x15   :  { %4301 = vmatpush3.bf16.msra.mxu1 %v4298_v29  ;;  %v682_v26 = vrot.slane %v4817_v21, 1  ;;  %v4354_v29 = vpack.c.bf16 %v1264_v18, %v1263_v17  ;;  %v1248_v31 = vld [vmem:[%s6368_s4 + $0x128] sm:$0xff]  ;;  %v1234_v38 = vld [vmem:[%s6368_s4 + $0xb8] sm:$0xff]  ;;  %v1217_v43 = vld [vmem:[%s6368_s4 + $0x30] sm:$0xff] }
  0x16   :  { %4269 = vmatpush3.bf16.msra.mxu0 %v4266_v30  ;;  %4303 = vmatprep.subr.bf16.mxu1 %v4302_v35  ;;  %v1247_v30 = vld [vmem:[%s6368_s4 + $0x120] sm:$0xff]  ;;  %v1249_v45 = vld [vmem:[%s6368_s4 + $0x130] sm:$0xff]  ;;  %v1250_v46 = vld [vmem:[%s6368_s4 + $0x138] sm:$0xff]  ;;  %v4326_v49 = vpack.c.bf16 %v1234_v38, %v1233_v37 }
  0x17   :  { %4271 = vmatprep.subr.bf16.mxu0 %v4270_v36  ;;  %v1218_v50 = vld [vmem:[%s6368_s4 + $0x38] sm:$0xff]  ;;  %v1267_v51 = vld [vmem:[%s6368_s4 + $0x1c0] sm:$0xff]  ;;  %v1268_v52 = vld [vmem:[%s6368_s4 + $0x1c8] sm:$0xff] }
  0x18   :  { %v1235_v53 = vld [vmem:[%s6368_s4 + $0xc0] sm:$0xff]  ;;  %v1236_v54 = vld [vmem:[%s6368_s4 + $0xc8] sm:$0xff]  ;;  %v4328_v58 = vpack.c.bf16 %v1218_v50, %v1217_v43  ;;  %v1237_v5 = vld [vmem:[%s6368_s4 + $0xd0] sm:$0xff] }
  0x19   :  { %4305 = vmatpush3.bf16.msra.mxu1 %v4302_v35  ;;  %v1266_v35 = vld [vmem:[%s6368_s4 + $0x1b8] sm:$0xff]  ;;  %v1219_v59 = vld [vmem:[%s6368_s4 + $0x40] sm:$0xff]  ;;  %v1252_v62 = vld [vmem:[%s6368_s4 + $0x148] sm:$0xff]  ;;  %v4330_v0 = vpack.c.bf16 %v1236_v54, %v1235_v53  ;;  %v703_v53 = vrot.slane %v4820_v22, 3  ;;  %v704_v54 = vrot.slane %v4817_v21, 3 }
  0x1a   :  { %4273 = vmatpush3.bf16.msra.mxu0 %v4270_v36  ;;  %4307 = vmatprep.subr.bf16.mxu1 %v4306_v41  ;;  %v683_v36 = vsel %vm680_vm1, %v681_v25, %v682_v26  ;;  %v4358_v44 = vpack.c.bf16 %v1266_v35, %v1265_v34  ;;  %v1251_v61 = vld [vmem:[%s6368_s4 + $0x140] sm:$0xff]  ;;  %v1220_v1 = vld [vmem:[%s6368_s4 + $0x48] sm:$0xff]  ;;  %v1238_v6 = vld [vmem:[%s6368_s4 + $0xd8] sm:$0xff] }
  0x1b   :  { %4275 = vmatprep.subr.bf16.mxu0 %v4274_v42  ;;  %v767_v39 = vcombine.low %v4820_v22, %v683_v36  ;;  %v768_v40 = vcombine.high %v4820_v22, %v683_v36  ;;  %v4332_v9 = vpack.c.bf16 %v1220_v1, %v1219_v59  ;;  %v1253_v12 = vld [vmem:[%s6368_s4 + $0x150] sm:$0xff]  ;;  %v1254_v13 = vld [vmem:[%s6368_s4 + $0x158] sm:$0xff]  ;;  %v1271_v17 = vld [vmem:[%s6368_s4 + $0x1e0] sm:$0xff] }
  0x1c   :  { %v1222_v16 = vld [vmem:[%s6368_s4 + $0x58] sm:$0xff]  ;;  %v1272_v18 = vld [vmem:[%s6368_s4 + $0x1e8] sm:$0xff]  ;;  %v1239_v19 = vld [vmem:[%s6368_s4 + $0xe0] sm:$0xff] }
  0x1d   :  { %4309 = vmatpush3.bf16.msra.mxu1 %v4306_v41  ;;  %v4324_v41 = vpack.c.bf16 %v1216_v28, %v1215_v24  ;;  %v1240_v20 = vld [vmem:[%s6368_s4 + $0xe8] sm:$0xff]  ;;  %v1223_v25 = vld [vmem:[%s6368_s4 + $0x60] sm:$0xff]  ;;  %v1274_v34 = vld [vmem:[%s6368_s4 + $0x1f8] sm:$0xff] }
  0x1e   :  { %4277 = vmatpush3.bf16.msra.mxu0 %v4274_v42  ;;  %4311 = vmatprep.subr.bf16.mxu1 %v4310_v47  ;;  %v4356_v42 = vpack.c.bf16 %v1248_v31, %v1247_v30  ;;  %v1255_v28 = vld [vmem:[%s6368_s4 + $0x160] sm:$0xff]  ;;  %v4338_v30 = vpack.c.bf16 %v1240_v20, %v1239_v19  ;;  %v1224_v31 = vld [vmem:[%s6368_s4 + $0x68] sm:$0xff]  ;;  %v1241_v35 = vld [vmem:[%s6368_s4 + $0xf0] sm:$0xff] }
  0x1f   :  { %4279 = vmatprep.subr.bf16.mxu0 %v4278_v48  ;;  %v1242_v36 = vld [vmem:[%s6368_s4 + $0xf8] sm:$0xff]  ;;  %v4340_v38 = vpack.c.bf16 %v1224_v31, %v1223_v25  ;;  %v1225_v43 = vld [vmem:[%s6368_s4 + $0x70] sm:$0xff]  ;;  %v1323_v20 = vld [vmem:[%s6368_s4 + $0x380] sm:$0xff] }
  0x21   :  { %4313 = vmatpush3.bf16.msra.mxu1 %v4310_v47  ;;  %v777_v47 = vrot.slane %v767_v39, %v4837_v32 }
  0x22   :  { %4281 = vmatpush3.bf16.msra.mxu0 %v4278_v48  ;;  %4347 = vmatprep.subr.bf16.mxu1 %v4346_v57  ;;  %v784_v48 = vrot.slane %v768_v40, %v4837_v32  ;;  %v4360_v57 = vpack.c.bf16 %v1250_v46, %v1249_v45  ;;  %v1257_v40 = vld [vmem:[%s6368_s4 + $0x170] sm:$0xff] }
  0x23   :  { %4315 = vmatprep.subr.bf16.mxu0 %v4314_v60  ;;  %v4883_v55 = vrot.slane %v777_v47, %v4837_v32  ;;  %v4362_v60 = vpack.c.bf16 %v1268_v52, %v1267_v51  ;;  %v1291_v47 = vld [vmem:[%s6368_s4 + $0x280] sm:$0xff]  ;;  %v692_v51 = vrot.slane %v4820_v22, 2  ;;  %v693_v52 = vrot.slane %v4817_v21, 2 }
  0x24   :  { %4201 = vmatmul.mubr.f32.vlgmr.msra.gmra.mrb[0].mxu1 %v42_v2  ;;  %v4886_v56 = vrot.slane %v784_v48, %v4837_v32  ;;  %v1292_v48 = vld [vmem:[%s6368_s4 + $0x288] sm:$0xff] }
  0x25   :  { %4166 = vmatmul.mubr.f32.vlgmr.msra.gmra.mrb[0].mxu0 %v42_v2  ;;  %4349 = vmatpush3.bf16.msra.mxu1 %v4348_v3  ;;  %v1269_v2 = vld [vmem:[%s6368_s4 + $0x1d0] sm:$0xff]  ;;  %v1270_v3 = vld [vmem:[%s6368_s4 + $0x1d8] sm:$0xff]  ;;  %v4378_v50 = vpack.c.bf16 %v1292_v48, %v1291_v47 }
  0x26   :  { %4317 = vmatpush3.bf16.msra.mxu0 %v4316_v8  ;;  %4351 = vmatprep.subr.bf16.mxu1 %v4350_v10  ;;  %v1411_v63 = vcombine.high %v4883_v55, %v4886_v56  ;;  %v4364_v8 = vpack.c.bf16 %v1252_v62, %v1251_v61  ;;  %v1221_v10 = vld [vmem:[%s6368_s4 + $0x50] sm:$0xff]  ;;  %v4366_v11 = vpack.c.bf16 %v1270_v3, %v1269_v2  ;;  %v1326_v47 = vld [vmem:[%s6368_s4 + $0x398] sm:$0xff] }
  0x27   :  { %4319 = vmatprep.subr.bf16.mxu0 %v4318_v15  ;;  %v4334_v15 = vpack.c.bf16 %v1238_v6, %v1237_v5  ;;  %v4336_v24 = vpack.c.bf16 %v1222_v16, %v1221_v10  ;;  %v646_v3 = vld [vmem:[%s6369_s1 + $0x10] sm:$0x3] }
  0x28   :  { %1897 = vmatprep.mubr.f32.mxu0 %v1411_v63  ;;  %v1275_v63 = vld [vmem:[%s6368_s4 + $0x200] sm:$0xff]  ;;  %v660_v6 = vrot.slane %v646_v3, 6  ;;  %v1293_v10 = vld [vmem:[%s6368_s4 + $0x290] sm:$0xff] }
  0x29   :  { %4353 = vmatpush3.bf16.msra.mxu1 %v4352_v23  ;;  %v4368_v23 = vpack.c.bf16 %v1254_v13, %v1253_v12  ;;  %v1277_v16 = vld [vmem:[%s6368_s4 + $0x210] sm:$0xff] }
  0x2a   :  { %4321 = vmatpush3.bf16.msra.mxu0 %v4320_v27  ;;  %4355 = vmatprep.subr.bf16.mxu1 %v4354_v29  ;;  %v4370_v27 = vpack.c.bf16 %v1272_v18, %v1271_v17  ;;  %v1256_v29 = vld [vmem:[%s6368_s4 + $0x168] sm:$0xff]  ;;  %v1278_v17 = vld [vmem:[%s6368_s4 + $0x218] sm:$0xff]  ;;  %v661_v18 = vsel %vm656_vm0, %v658_v14, %v660_v6  ;;  %v1327_v6 = vld [vmem:[%s6368_s4 + $0x3a0] sm:$0xff] }
  0x2b   :  { %4323 = vmatprep.subr.bf16.mxu0 %v4322_v33  ;;  %v1273_v33 = vld [vmem:[%s6368_s4 + $0x1f0] sm:$0xff]  ;;  %v4372_v37 = vpack.c.bf16 %v1256_v29, %v1255_v28  ;;  %v4384_v19 = vpack.c.bf16 %v1278_v17, %v1277_v16  ;;  %v1308_v28 = vld [vmem:[%s6368_s4 + $0x308] sm:$0xff]  ;;  %v1311_v16 = vld [vmem:[%s6368_s4 + $0x320] sm:$0xff] }
  0x2c   :  { %v4374_v39 = vpack.c.bf16 %v1274_v34, %v1273_v33  ;;  %v1295_v34 = vld [vmem:[%s6368_s4 + $0x2a0] sm:$0xff]  ;;  %v1312_v17 = vld [vmem:[%s6368_s4 + $0x328] sm:$0xff] }
  0x2d   :  { %4357 = vmatpush3.bf16.msra.mxu1 %v4356_v42  ;;  %v4342_v42 = vpack.c.bf16 %v1242_v36, %v1241_v35  ;;  %v1296_v35 = vld [vmem:[%s6368_s4 + $0x2a8] sm:$0xff] }
  0x2e   :  { %4325 = vmatpush3.bf16.msra.mxu0 %v4324_v41  ;;  %4359 = vmatprep.subr.bf16.mxu1 %v4358_v44  ;;  %v1258_v41 = vld [vmem:[%s6368_s4 + $0x178] sm:$0xff] }
  0x2f   :  { %4327 = vmatprep.subr.bf16.mxu0 %v4326_v49  ;;  %v1226_v44 = vld [vmem:[%s6368_s4 + $0x78] sm:$0xff]  ;;  %v4376_v45 = vpack.c.bf16 %v1258_v41, %v1257_v40  ;;  %v1410_v49 = vcombine.low %v4883_v55, %v4886_v56  ;;  %v705_v55 = vsel %vm702_vm3, %v703_v53, %v704_v54  ;;  %v1279_v40 = vld [vmem:[%s6368_s4 + $0x220] sm:$0xff]  ;;  %v1280_v41 = vld [vmem:[%s6368_s4 + $0x228] sm:$0xff] }
  0x30   :  { %v4344_v46 = vpack.c.bf16 %v1226_v44, %v1225_v43  ;;  %v1310_v53 = vld [vmem:[%s6368_s4 + $0x318] sm:$0xff] }
  0x31   :  { %4361 = vmatpush3.bf16.msra.mxu1 %v4360_v57  ;;  %v694_v57 = vsel %vm691_vm2, %v692_v51, %v693_v52  ;;  %v1309_v51 = vld [vmem:[%s6368_s4 + $0x310] sm:$0xff] }
  0x32   :  { %4329 = vmatpush3.bf16.msra.mxu0 %v4328_v58  ;;  %4363 = vmatprep.subr.bf16.mxu1 %v4362_v60  ;;  %v769_v56 = vcombine.low %v694_v57, %v705_v55  ;;  %v770_v58 = vcombine.high %v694_v57, %v705_v55 }
  0x33   :  { %4331 = vmatprep.subr.bf16.mxu0 %v4330_v0  ;;  %v1276_v0 = vld [vmem:[%s6368_s4 + $0x208] sm:$0xff] }
  0x34   :  { %v791_v59 = vrot.slane %v769_v56, %v4837_v32  ;;  %v798_v60 = vrot.slane %v770_v58, %v4837_v32  ;;  %v4380_v2 = vpack.c.bf16 %v1276_v0, %v1275_v63  ;;  %v4416_v58 = vpack.c.bf16 %v1310_v53, %v1309_v51  ;;  %v1281_v63 = vld [vmem:[%s6368_s4 + $0x230] sm:$0xff]  ;;  %v1282_v0 = vld [vmem:[%s6368_s4 + $0x238] sm:$0xff] }
  0x35   :  { %4365 = vmatpush3.bf16.msra.mxu1 %v4364_v8  ;;  %v647_v8 = vld [vmem:[%s6369_s1 + $0x18] sm:$0xff]  ;;  %v1313_v51 = vld [vmem:[%s6368_s4 + $0x330] sm:$0xff] }
  0x36   :  { %4333 = vmatpush3.bf16.msra.mxu0 %v4332_v9  ;;  %4367 = vmatprep.subr.bf16.mxu1 %v4366_v11  ;;  %v1395_v61 = vrot.slane %v791_v59, %v4837_v32  ;;  %v1409_v62 = vrot.slane %v798_v60, %v4837_v32  ;;  %v5011_v9 = vld [vmem:[%s6369_s1 + $0x20] sm:$0xff]  ;;  %v1294_v11 = vld [vmem:[%s6368_s4 + $0x298] sm:$0xff]  ;;  %v662_v12 = vrot.slane %v647_v8, 6  ;;  %v1297_v59 = vld [vmem:[%s6368_s4 + $0x2b0] sm:$0xff] }
  0x37   :  { %4335 = vmatprep.subr.bf16.mxu0 %v4334_v15  ;;  %v663_v13 = vrot.slane %v5011_v9, 6  ;;  %v4382_v15 = vpack.c.bf16 %v1294_v11, %v1293_v10  ;;  %v1328_v8 = vld [vmem:[%s6368_s4 + $0x3a8] sm:$0xff]  ;;  %v1314_v53 = vld [vmem:[%s6368_s4 + $0x338] sm:$0xff] }
  0x38   :  { %v1413_v1 = vcombine.high %v1395_v61, %v1409_v62  ;;  %v1412_v5 = vcombine.low %v1395_v61, %v1409_v62  ;;  %v5044_v7 = vsel %vm656_vm0, 0.0, %v662_v12  ;;  %v1316_v9 = vld [vmem:[%s6368_s4 + $0x348] sm:$0xff] }
  0x39   :  { %4369 = vmatpush3.bf16.msra.mxu1 %v4368_v23  ;;  %v1324_v23 = vld [vmem:[%s6368_s4 + $0x388] sm:$0xff]  ;;  %v5041_v25 = vsel %vm656_vm0, %v662_v12, %v663_v13  ;;  %v697_v36 = vrot.slane %v5044_v7, 2 }
  0x3a   :  { %4337 = vmatpush3.bf16.msra.mxu0 %v4336_v24  ;;  %4371 = vmatprep.subr.bf16.mxu1 %v4370_v27  ;;  %v5036_v24 = vsel %vm673_vm4, %v661_v18, 0.0  ;;  %v4410_v14 = vpack.c.bf16 %v1324_v23, %v1323_v20  ;;  %v1307_v27 = vld [vmem:[%s6368_s4 + $0x300] sm:$0xff]  ;;  %v687_v31 = vrot.slane %v5041_v25, 1  ;;  %v649_v23 = vld [vmem:[%s6369_s1 + $0x28] sm:$0x3] }
  0x3b   :  { %4339 = vmatprep.subr.bf16.mxu0 %v4338_v30  ;;  %1987 = vmatprep.mubr.f32.mxu1 %v1413_v1  ;;  %v684_v29 = vrot.slane %v5036_v24, 1  ;;  %v686_v30 = vrot.slane %v5044_v7, 1  ;;  %v4412_v33 = vpack.c.bf16 %v1308_v28, %v1307_v27  ;;  %v695_v43 = vrot.slane %v5036_v24, 2  ;;  %v1299_v28 = vld [vmem:[%s6368_s4 + $0x2c0] sm:$0xff] }
  0x3c   :  { %v706_v44 = vrot.slane %v5036_v24, 3  ;;  %v4420_v27 = vpack.c.bf16 %v1312_v17, %v1311_v16 }
  0x3d   :  { %4373 = vmatpush3.bf16.msra.mxu1 %v4372_v37  ;;  %v698_v37 = vrot.slane %v5041_v25, 2  ;;  %v696_v57 = vsel %vm691_vm2, %v693_v52, %v695_v43  ;;  %v1298_v52 = vld [vmem:[%s6368_s4 + $0x2b8] sm:$0xff]  ;;  %v947_v3 = vcombine.low %v5036_v24, %v684_v29 }
  0x3e   :  { %4341 = vmatpush3.bf16.msra.mxu0 %v4340_v38  ;;  %4375 = vmatprep.subr.bf16.mxu1 %v4374_v39  ;;  %v708_v38 = vrot.slane %v5044_v7, 3  ;;  %v4386_v39 = vpack.c.bf16 %v1296_v35, %v1295_v34  ;;  %v707_v55 = vsel %vm702_vm3, %v704_v54, %v706_v44  ;;  %v4390_v62 = vpack.c.bf16 %v1298_v52, %v1297_v59  ;;  %v1301_v52 = vld [vmem:[%s6368_s4 + $0x2d0] sm:$0xff] }
  0x3f   :  { %4343 = vmatprep.subr.bf16.mxu0 %v4342_v42  ;;  %v685_v42 = vsel %vm680_vm1, %v682_v26, %v684_v29  ;;  %v5086_v26 = vsel %vm680_vm1, %v686_v30, %v687_v31  ;;  %v5107_v56 = vsel %vm691_vm2, %v697_v36, %v698_v37  ;;  %v859_v54 = vcombine.low %v696_v57, %v707_v55  ;;  %v1300_v29 = vld [vmem:[%s6368_s4 + $0x2c8] sm:$0xff] }
  0x40   :  { %v857_v48 = vcombine.low %v4817_v21, %v685_v42  ;;  %v860_v1 = vcombine.high %v696_v57, %v707_v55  ;;  %v955_v20 = vrot.slane %v947_v3, %v4837_v32  ;;  %v4394_v35 = vpack.c.bf16 %v1300_v29, %v1299_v28 }
  0x41   :  { %4377 = vmatpush3.bf16.msra.mxu1 %v4376_v45  ;;  %v4388_v45 = vpack.c.bf16 %v1280_v41, %v1279_v40  ;;  %v881_v12 = vrot.slane %v859_v54, %v4837_v32  ;;  %v990_v40 = vcombine.high %v5044_v7, %v5086_v26  ;;  %v4424_v59 = vpack.c.bf16 %v1314_v53, %v1313_v51  ;;  %v1317_v53 = vld [vmem:[%s6368_s4 + $0x350] sm:$0xff] }
  0x42   :  { %4345 = vmatpush3.bf16.msra.mxu0 %v4344_v46  ;;  %4411 = vmatprep.subr.bf16.mxu1 %v4410_v14  ;;  %v1325_v46 = vld [vmem:[%s6368_s4 + $0x390] sm:$0xff]  ;;  %v867_v60 = vrot.slane %v857_v48, %v4837_v32  ;;  %v888_v18 = vrot.slane %v860_v1, %v4837_v32  ;;  %v665_v48 = vrot.slane %v649_v23, 6  ;;  %v948_v54 = vcombine.low %v695_v43, %v706_v44  ;;  %v1332_v43 = vld [vmem:[%s6368_s4 + $0x3c8] sm:$0xff] }
  0x43   :  { %4379 = vmatprep.subr.bf16.mxu0 %v4378_v50  ;;  %v4414_v50 = vpack.c.bf16 %v1326_v47, %v1325_v46  ;;  %v1485_v30 = vrot.slane %v881_v12, %v4837_v32  ;;  %v5181_v57 = vrot.slane %v990_v40, %v4837_v32  ;;  %v1315_v12 = vld [vmem:[%s6368_s4 + $0x340] sm:$0xff] }
  0x44   :  { %1988 = vmatmul.mubr.f32.vlgmr.msra.gmra.mrb[2].mxu1 %v1412_v5  ;;  %v4392_v5 = vpack.c.bf16 %v1282_v0, %v1281_v63  ;;  %v1478_v10 = vrot.slane %v867_v60, %v4837_v32  ;;  %v1499_v36 = vrot.slane %v888_v18, %v4837_v32  ;;  %v1302_v60 = vld [vmem:[%s6368_s4 + $0x2d8] sm:$0xff]  ;;  %v1285_v63 = vld [vmem:[%s6368_s4 + $0x250] sm:$0xff]  ;;  %v666_v44 = vsel %vm656_vm0, %v663_v13, %v665_v48 }
  0x45   :  { %1898 = vmatmul.mubr.f32.vlgmr.msra.gmra.mrb[2].mxu0 %v1410_v49  ;;  %4413 = vmatpush3.bf16.msra.mxu1 %v4412_v33  ;;  %v858_v49 = vcombine.high %v4817_v21, %v685_v42  ;;  %v989_v33 = vcombine.low %v5044_v7, %v5086_v26  ;;  %v1329_v42 = vld [vmem:[%s6368_s4 + $0x3b0] sm:$0xff]  ;;  %v1286_v0 = vld [vmem:[%s6368_s4 + $0x258] sm:$0xff]  ;;  %v4428_v23 = vpack.c.bf16 %v1316_v9, %v1315_v12  ;;  %v1320_v12 = vld [vmem:[%s6368_s4 + $0x368] sm:$0xff] }
  0x46   :  { %4381 = vmatpush3.bf16.msra.mxu0 %v4380_v2  ;;  %4415 = vmatprep.subr.bf16.mxu1 %v4414_v50  ;;  %v709_v2 = vrot.slane %v5041_v25, 3  ;;  %v1502_v26 = vcombine.low %v1485_v30, %v1499_v36 }
  0x47   :  { %4383 = vmatprep.subr.bf16.mxu0 %v4382_v15  ;;  %v874_v61 = vrot.slane %v858_v49, %v4837_v32  ;;  %v4418_v15 = vpack.c.bf16 %v1328_v8, %v1327_v6  ;;  %v999_v47 = vrot.slane %v989_v33, %v4837_v32  ;;  %v1503_v49 = vcombine.high %v1485_v30, %v1499_v36  ;;  %v1331_v6 = vld [vmem:[%s6368_s4 + $0x3c0] sm:$0xff] }
  0x49   :  { %4417 = vmatpush3.bf16.msra.mxu1 %v4416_v58  ;;  %v1492_v11 = vrot.slane %v874_v61, %v4837_v32  ;;  %v3707_v58 = vcombine.low %v955_v20, %v999_v47  ;;  %1992 = vmatprep.mubr.f32.mxu1 %v1503_v49  ;;  %v4398_v61 = vpack.c.bf16 %v1302_v60, %v1301_v52  ;;  %v1305_v60 = vld [vmem:[%s6368_s4 + $0x2f0] sm:$0xff] }
  0x4a   :  { %4385 = vmatpush3.bf16.msra.mxu0 %v4384_v19  ;;  %v710_v19 = vsel %vm702_vm3, %v708_v38, %v709_v2  ;;  %4419 = vmatprep.subr.bf16.mxu1 %v4418_v15  ;;  %v1283_v38 = vld [vmem:[%s6368_s4 + $0x240] sm:$0xff] }
  0x4b   :  { %4387 = vmatprep.subr.bf16.mxu0 %v4386_v39  ;;  %v1501_v14 = vcombine.high %v1478_v10, %v1492_v11  ;;  %v1500_v34 = vcombine.low %v1478_v10, %v1492_v11  ;;  %v1284_v39 = vld [vmem:[%s6368_s4 + $0x248] sm:$0xff]  ;;  %v991_v46 = vcombine.low %v5107_v56, %v710_v19  ;;  %1993 = vmatmul.mubr.f32.gmra.mrb[4].mxu1 %v1502_v26  ;;  %v5216_v11 = vsel %vm673_vm4, %v666_v44, 0.0 }
  0x4c   :  { %v4396_v41 = vpack.c.bf16 %v1284_v39, %v1283_v38  ;;  %v1568_v3 = vrot.slane %v3707_v58, %v4837_v32  ;;  %v4426_v10 = vpack.c.bf16 %v1332_v43, %v1331_v6  ;;  %v689_v15 = vrot.slane %v5216_v11, 1  ;;  %v1334_v39 = vld [vmem:[%s6368_s4 + $0x3d8] sm:$0xff] }
  0x4d   :  { %1902 = vmatprep.mubr.f32.mxu0 %v1501_v14  ;;  %4421 = vmatpush3.bf16.msra.mxu1 %v4420_v27  ;;  %v1013_v55 = vrot.slane %v991_v46, %v4837_v32  ;;  %v700_v16 = vrot.slane %v5216_v11, 2  ;;  %v711_v17 = vrot.slane %v5216_v11, 3  ;;  %v1303_v14 = vld [vmem:[%s6368_s4 + $0x2e0] sm:$0xff]  ;;  %v1304_v27 = vld [vmem:[%s6368_s4 + $0x2e8] sm:$0xff] }
  0x4e   :  { %4389 = vmatpush3.bf16.msra.mxu0 %v4388_v45  ;;  %v1330_v45 = vld [vmem:[%s6368_s4 + $0x3b8] sm:$0xff]  ;;  %v690_v29 = vsel %vm680_vm1, %v687_v31, %v689_v15 }
  0x4f   :  { %4391 = vmatprep.subr.bf16.mxu0 %v4390_v62  ;;  %1903 = vmatmul.mubr.f32.gmra.mrb[4].mxu0 %v1500_v34  ;;  %v4422_v50 = vpack.c.bf16 %v1330_v45, %v1329_v42  ;;  %v992_v62 = vcombine.high %v5107_v56, %v710_v19  ;;  %v1022_v1 = vcombine.high %v999_v47, %v1013_v55  ;;  %v1287_v34 = vld [vmem:[%s6368_s4 + $0x260] sm:$0xff] }
  0x50   :  { %v962_v56 = vrot.slane %v948_v54, %v4837_v32  ;;  %v701_v30 = vsel %vm691_vm2, %v698_v37, %v700_v16  ;;  %v712_v33 = vsel %vm702_vm3, %v709_v2, %v711_v17  ;;  %v1079_v31 = vcombine.low %v5041_v25, %v690_v29  ;;  %v1288_v37 = vld [vmem:[%s6368_s4 + $0x268] sm:$0xff]  ;;  %v1333_v2 = vld [vmem:[%s6368_s4 + $0x3d0] sm:$0xff] }
  0x51   :  { %4423 = vmatprep.subr.bf16.mxu1 %v4422_v50  ;;  %v5213_v8 = vrot.slane %v992_v62, %v4837_v32  ;;  %v3709_v13 = vcombine.low %v1022_v1, %v5181_v57  ;;  %v1080_v38 = vcombine.high %v5041_v25, %v690_v29  ;;  %v1081_v42 = vcombine.low %v701_v30, %v712_v33  ;;  %v1289_v54 = vld [vmem:[%s6368_s4 + $0x270] sm:$0xff]  ;;  %v1290_v1 = vld [vmem:[%s6368_s4 + $0x278] sm:$0xff] }
  0x52   :  { %4393 = vmatpush3.bf16.msra.mxu0 %v4392_v5  ;;  %v4400_v5 = vpack.c.bf16 %v1286_v0, %v1285_v63  ;;  %4425 = vmatpush3.bf16.msra.mxu1 %v4424_v59  ;;  %v3708_v19 = vcombine.low %v962_v56, %v1013_v55  ;;  %v4402_v45 = vpack.c.bf16 %v1304_v27, %v1303_v14  ;;  %v1355_v27 = vld [vmem:[%s6368_s4 + $0x480] sm:$0xff] }
  0x53   :  { %4395 = vmatprep.subr.bf16.mxu0 %v4394_v35  ;;  %v1023_v18 = vcombine.low %v5181_v57, %v5213_v8  ;;  %4427 = vmatprep.subr.bf16.mxu1 %v4426_v10  ;;  %v1024_v20 = vcombine.high %v5181_v57, %v5213_v8  ;;  %v1582_v28 = vrot.slane %v3709_v13, %v4837_v32  ;;  %v1318_v57 = vld [vmem:[%s6368_s4 + $0x358] sm:$0xff]  ;;  %v1319_v10 = vld [vmem:[%s6368_s4 + $0x360] sm:$0xff] }
  0x54   :  { %v1575_v36 = vrot.slane %v3708_v19, %v4837_v32  ;;  %v1089_v47 = vrot.slane %v1079_v31, %v4837_v32  ;;  %v1096_v48 = vrot.slane %v1080_v38, %v4837_v32  ;;  %v1082_v49 = vcombine.high %v701_v30, %v712_v33 }
  0x55   :  { %v3710_v35 = vcombine.high %v1013_v55, %v1023_v18  ;;  %v1591_v40 = vcombine.high %v1568_v3, %v1582_v28  ;;  %v1103_v26 = vrot.slane %v1081_v42, %v4837_v32  ;;  %v4404_v50 = vpack.c.bf16 %v1288_v37, %v1287_v34 }
  0x56   :  { %4397 = vmatpush3.bf16.msra.mxu0 %v4396_v41  ;;  %4429 = vmatpush3.bf16.msra.mxu1 %v4428_v23  ;;  %v1590_v41 = vcombine.low %v1568_v3, %v1582_v28  ;;  %v4430_v51 = vpack.c.bf16 %v1334_v39, %v1333_v2  ;;  %v3715_v59 = vcombine.low %v1024_v20, %v1089_v47  ;;  %v1335_v3 = vld [vmem:[%s6368_s4 + $0x3e0] sm:$0xff]  ;;  %v1321_v2 = vld [vmem:[%s6368_s4 + $0x370] sm:$0xff]  ;;  %v1322_v39 = vld [vmem:[%s6368_s4 + $0x378] sm:$0xff] }
  0x57   :  { %4399 = vmatprep.subr.bf16.mxu0 %v4398_v61  ;;  %v1589_v46 = vrot.slane %v3710_v35, %v4837_v32  ;;  %1907 = vmatprep.mubr.f32.mxu0 %v1591_v40  ;;  %v5278_v52 = vrot.slane %v1082_v49, %v4837_v32  ;;  %v1306_v61 = vld [vmem:[%s6368_s4 + $0x2f8] sm:$0xff]  ;;  %v1112_v62 = vcombine.high %v1089_v47, %v1103_v26 }
  0x58   :  { %1908 = vmatmul.mubr.f32.gmra.mrb[6].mxu0 %v1590_v41  ;;  %v1111_v63 = vcombine.low %v1089_v47, %v1103_v26  ;;  %4431 = vmatprep.subr.bf16.mxu1 %v4430_v51  ;;  %v1169_v0 = vcombine.low %v5216_v11, %v689_v15  ;;  %v1658_v6 = vrot.slane %v3715_v59, %v4837_v32  ;;  %v1338_v35 = vld [vmem:[%s6368_s4 + $0x3f8] sm:$0xff]  ;;  %v718_v47 = vrot.slane %v5044_v7, 4  ;;  %v5353_v59 = vld [vmem:[%s6368_s4 + $0x400] sm:$0xff] }
  0x59   :  { %v1593_v55 = vcombine.high %v1575_v36, %v1589_v46  ;;  %v1592_v58 = vcombine.low %v1575_v36, %v1589_v46  ;;  %v1113_v43 = vcombine.low %v1096_v48, %v5278_v52  ;;  %v1114_v44 = vcombine.high %v1096_v48, %v5278_v52 }
  0x5a   :  { %4401 = vmatpush3.bf16.msra.mxu0 %v4400_v5  ;;  %v1336_v5 = vld [vmem:[%s6368_s4 + $0x3e8] sm:$0xff]  ;;  %v4432_v56 = vpack.c.bf16 %v1318_v57, %v1317_v53  ;;  %v3717_v9 = vcombine.low %v1112_v62, %v1096_v48  ;;  %v3716_v13 = vcombine.high %v5213_v8, %v1111_v63  ;;  %v1177_v15 = vrot.slane %v1169_v0, %v4837_v32  ;;  %v5366_v62 = vld [vmem:[%s6368_s4 + $0x490] sm:$0xff]  ;;  %v5371_v63 = vld [vmem:[%s6368_s4 + $0x498] sm:$0xff] }
  0x5b   :  { %4403 = vmatprep.subr.bf16.mxu0 %v4402_v45  ;;  %1997 = vmatprep.mubr.f32.mxu1 %v1593_v55  ;;  %v4406_v18 = vpack.c.bf16 %v1306_v61, %v1305_v60  ;;  %v3718_v19 = vcombine.high %v1103_v26, %v1113_v43  ;;  %v1170_v20 = vcombine.low %v700_v16, %v711_v17  ;;  %v1356_v8 = vld [vmem:[%s6368_s4 + $0x488] sm:$0xff]  ;;  %v1337_v17 = vld [vmem:[%s6368_s4 + $0x3f0] sm:$0xff]  ;;  %v719_v26 = vrot.slane %v5041_v25, 4 }
  0x5c   :  { %1998 = vmatmul.mubr.f32.gmra.mrb[6].mxu1 %v1592_v58  ;;  %v4408_v23 = vpack.c.bf16 %v1290_v1, %v1289_v54  ;;  %v4434_v14 = vpack.c.bf16 %v1336_v5, %v1335_v3  ;;  %v1672_v28 = vrot.slane %v3717_v9, %v4837_v32  ;;  %v1665_v29 = vrot.slane %v3716_v13, %v4837_v32  ;;  %v5376_v0 = vld [vmem:[%s6368_s4 + $0x410] sm:$0xff]  ;;  %v5391_v1 = vld [vmem:[%s6368_s4 + $0x4a8] sm:$0xff]  ;;  %v5396_v3 = vld [vmem:[%s6368_s4 + $0x420] sm:$0xff] }
  0x5d   :  { %4433 = vmatpush3.bf16.msra.mxu1 %v4432_v56  ;;  %v3723_v30 = vcombine.low %v1114_v44, %v1177_v15  ;;  %v4436_v33 = vpack.c.bf16 %v1320_v12, %v1319_v10  ;;  %v1679_v34 = vrot.slane %v3718_v19, %v4837_v32  ;;  %v1184_v16 = vrot.slane %v1170_v20, %v4837_v32  ;;  %v3705_v5 = vld [vmem:[%s6370_s3] ss:$0 sm:$0xff]  ;;  %v5409_v43 = vld [vmem:[%s6368_s4 + $0x4b0] sm:$0xff]  ;;  %v5414_v44 = vld [vmem:[%s6368_s4 + $0x4b8] sm:$0xff] }
  0x5e   :  { %4405 = vmatpush3.bf16.msra.mxu0 %v4404_v50  ;;  %4435 = vmatprep.subr.bf16.mxu1 %v4434_v14  ;;  %v1681_v36 = vcombine.high %v1658_v6, %v1672_v28  ;;  %v1680_v31 = vcombine.low %v1658_v6, %v1672_v28  ;;  %v4442_v37 = vpack.c.bf16 %v1356_v8, %v1355_v27  ;;  %v6379_v50 = vrot.slane %v5216_v11, 4  ;;  %v5404_v6 = vld [vmem:[%s6368_s4 + $0x428] sm:$0xff]  ;;  %v5419_v56 = vld [vmem:[%s6368_s4 + $0x430] sm:$0xff]  ;;  %v5424_v10 = vld [vmem:[%s6368_s4 + $0x438] sm:$0xff] }
  0x5f   :  { %4407 = vmatprep.subr.bf16.mxu0 %v4406_v18  ;;  %v1746_v38 = vrot.slane %v3723_v30, %v4837_v32  ;;  %v1683_v40 = vcombine.high %v1665_v29, %v1679_v34  ;;  %v1682_v41 = vcombine.low %v1665_v29, %v1679_v34  ;;  %v1185_v42 = vcombine.low %v1177_v15, %v1184_v16  ;;  %v5429_v12 = vld [vmem:[%s6368_s4 + $0x4c0] sm:$0xff]  ;;  %v5437_v13 = vld [vmem:[%s6368_s4 + $0x4c8] sm:$0xff]  ;;  %v5465_v27 = vld [vmem:[%s6368_s4 + $0x4d0] sm:$0xff] }
  0x60   :  { %1912 = vmatprep.mubr.f32.mxu0 %v1681_v36  ;;  %v4438_v46 = vpack.c.bf16 %v1338_v35, %v1337_v17  ;;  %v4440_v49 = vpack.c.bf16 %v1322_v39, %v1321_v2  ;;  %v5343_v53 = vsel %vm673_vm4, %v718_v47, %v719_v26  ;;  %v5348_v7 = vsel %vm673_vm4, %v719_v26, %v6379_v50  ;;  %v5442_v15 = vld [vmem:[%s6368_s4 + $0x440] sm:$0xff]  ;;  %v5447_v18 = vld [vmem:[%s6368_s4 + $0x448] sm:$0xff]  ;;  %v5475_v8 = vld [vmem:[%s6368_s4 + $0x450] sm:$0xff] }
  0x61   :  { %4437 = vmatpush3.bf16.msra.mxu1 %v4436_v33  ;;  %v1754_v45 = vcombine.high %v1746_v38, %v1746_v38  ;;  %1913 = vmatmul.mubr.f32.gmra.mrb[8].mxu0 %v1680_v31  ;;  %v3724_v48 = vcombine.high %v5278_v52, %v1185_v42  ;;  %v4572_v25 = vmov 1966171168   ;;  %v5358_v52 = vld [vmem:[%s6368_s4 + $0x408] sm:$0xff]  ;;  %v713_v60 = vrot.slane %v4820_v22, 4  ;;  %v5386_v22 = vld [vmem:[%s6368_s4 + $0x4a0] sm:$0xff]  ;;  %6391 = vst [vmem:[#allocation2_spill] sm:$0xff] %v5475_v8 }
  0x62   :  { %4409 = vmatpush3.bf16.msra.mxu0 %v4408_v23  ;;  %2002 = vmatprep.mubr.f32.mxu1 %v1683_v40  ;;  %v236_v55 = vunpack.c.l.s4 %v4572_v25  ;;  %v714_v61 = vrot.slane %v4817_v21, 4  ;;  %v6380_v54 = vrot.slane %v5036_v24, 4  ;;  %v5381_v21 = vld [vmem:[%s6368_s4 + $0x418] sm:$0xff]  ;;  %v5450_v19 = vsub.s32 0, %v4779_v4  ;;  %v5493_v17 = vld [vmem:[%s6368_s4 + $0x4e0] sm:$0xff]  ;;  %v5498_v35 = vld [vmem:[%s6368_s4 + $0x4e8] sm:$0xff] }
  0x63   :  { %4443 = vmatprep.subr.bf16.mxu0 %v4442_v37  ;;  %2003 = vmatmul.mubr.f32.gmra.mrb[8].mxu1 %v1682_v41  ;;  %v1753_v51 = vrot.slane %v3724_v48, %v4837_v32  ;;  %v5488_v16 = vld [vmem:[%s6368_s4 + $0x458] sm:$0xff]  ;;  %6393 = vst [vmem:[#allocation4_spill] sm:$0xff] %v5493_v17  ;;  %6394 = vst [vmem:[#allocation5_spill] sm:$0xff] %v5498_v35 }
  0x64   :  { %1917 = vmatprep.mubr.f32.mxu0 %v1754_v45  ;;  %4439 = vmatprep.subr.bf16.mxu1 %v4438_v46  ;;  %v237_v58 = vunpack.c.0.s8 %v236_v55  ;;  %v5453_v20 = vsel %vm673_vm4, %v713_v60, %v714_v61  ;;  %v5460_v14 = vsel %vm673_vm4, %v714_v61, %v6380_v54  ;;  %6392 = vst [vmem:[#allocation3_spill] sm:$0xff] %v5488_v16 }
  0x65   :  { %4441 = vmatpush3.bf16.msra.mxu1 %v4440_v49  ;;  %1918 = vmatmul.mubr.f32.gmra.mrb[10].mxu0 %v1746_v38  ;;  %v1755_v57 = vcombine.high %v1753_v51, %v1753_v51 }
  0x66   :  { %v5432_v9 = vsub.s32 %v237_v58, %v4779_v4  ;;  %v5470_v4 = vld [vmem:[%s6368_s4 + $0x4d8] sm:$0xff] }
  0x67   :  { %2007 = vmatprep.mubr.f32.mxu1 %v1755_v57 }
  0x68   :  { %2008 = vmatmul.mubr.f32.gmra.mrb[10].mxu1 %v1753_v51 }
  0xf7   :  { %v4202_v28 = vpop.f32.mrb[0].mxu1 }
  0xf8   :  { %v229_v36 = vadd.f32 %v4202_v28, %v3705_v5  ;;  %v4167_v31 = vpop.f32.mrb[0].mxu0  ;;  %v223_v38 = vpop.f32.mrb[1].mxu1 }
  0xf9   :  { %v154_v40 = vadd.f32 %v4167_v31, %v3705_v5  ;;  %v224_v41 = vadd.f32 %v3705_v5, %v223_v38  ;;  %v148_v42 = vpop.f32.mrb[1].mxu0 }
  0xfa   :  { %v399_v47 = vcombine.high %v229_v36, %v229_v36  ;;  %v406_v48 = vrot.slane %v229_v36, %v5432_v9  ;;  %v5516_v55 = vadd.f32 %v3705_v5, %v148_v42 }
  0xfb   :  { %v283_v51 = vcombine.high %v154_v40, %v154_v40  ;;  %v290_v57 = vrot.slane %v154_v40, %v5432_v9  ;;  %v350_v25 = vcombine.high %v224_v41, %v224_v41  ;;  %v357_v28 = vrot.slane %v224_v41, %v5432_v9 }
  0xfc   :  { %v413_v58 = vrot.slane %v399_v47, %v5432_v9  ;;  %v414_v60 = vcombine.high %v406_v48, %v406_v48  ;;  %v422_v61 = vrot.slane %v406_v48, %v5432_v9 }
  0xfd   :  { %v297_v36 = vrot.slane %v283_v51, %v5432_v9  ;;  %v298_v31 = vcombine.high %v290_v57, %v290_v57  ;;  %v306_v38 = vrot.slane %v290_v57, %v5432_v9  ;;  %v364_v26 = vrot.slane %v350_v25, %v5432_v9 }
  0xfe   :  { %v415_v49 = vcombine.high %v413_v58, %v413_v58  ;;  %v429_v40 = vrot.slane %v413_v58, %v5432_v9  ;;  %v436_v5 = vrot.slane %v414_v60, %v5432_v9  ;;  %v444_v42 = vcombine.high %v422_v61, %v422_v61 }
  0xff   :  { %v483_v47 = vrot.slane %v422_v61, %v5450_v19  ;;  %v299_v46 = vcombine.high %v297_v36, %v297_v36  ;;  %v313_v48 = vrot.slane %v297_v36, %v5432_v9  ;;  %v320_v41 = vrot.slane %v298_v31, %v5432_v9 }
 0x100   :  { %v443_v51 = vrot.slane %v415_v49, %v5432_v9  ;;  %v445_v45 = vcombine.high %v429_v40, %v429_v40  ;;  %v446_v39 = vcombine.high %v436_v5, %v436_v5  ;;  %v487_v57 = vrot.slane %v436_v5, %v5450_v19 }
 0x101   :  { %v491_v25 = vrot.slane %v444_v42, %v5450_v19  ;;  %v499_v58 = vrot.slane %v429_v40, %v5450_v19  ;;  %v327_v60 = vrot.slane %v299_v46, %v5432_v9  ;;  %v328_v2 = vcombine.high %v306_v38, %v306_v38 }
 0x102   :  { %v447_v37 = vcombine.high %v443_v51, %v443_v51  ;;  %v495_v61 = vrot.slane %v446_v39, %v5450_v19  ;;  %v503_v36 = vrot.slane %v443_v51, %v5450_v19  ;;  %v507_v31 = vrot.slane %v445_v45, %v5450_v19 }
 0x103   :  { %v329_v34 = vcombine.high %v313_v48, %v313_v48  ;;  %v330_v49 = vcombine.high %v320_v41, %v320_v41  ;;  %v331_v50 = vcombine.high %v327_v60, %v327_v60  ;;  %v537_v33 = vsel %vm528_vm5, %v306_v38, %v483_v47 }
 0x104   :  { %v511_v5 = vrot.slane %v447_v37, %v5450_v19  ;;  %v538_v40 = vsel %vm528_vm5, %v320_v41, %v487_v57  ;;  %v539_v46 = vsel %vm528_vm5, %v328_v2, %v491_v25  ;;  %v541_v42 = vsel %vm528_vm5, %v313_v48, %v499_v58  ;;  %v5552_v48 = vld [vmem:[%s6368_s4 + $0x460] sm:$0xff]  ;;  %v5566_v57 = vld [vmem:[%s6368_s4 + $0x4f0] sm:$0xff]  ;;  %v5571_v25 = vld [vmem:[%s6368_s4 + $0x4f8] sm:$0xff] }
 0x105   :  { %v540_v39 = vsel %vm528_vm5, %v330_v49, %v495_v61  ;;  %v542_v51 = vsel %vm528_vm5, %v327_v60, %v503_v36  ;;  %v543_v45 = vsel %vm528_vm5, %v329_v34, %v507_v31  ;;  %v595_v30 = vcombine.low %v537_v33, %v538_v40  ;;  %6395 = vst [vmem:[#allocation6_spill] sm:$0xff] %v5552_v48  ;;  %v5557_v33 = vld [vmem:[%s6368_s4 + $0x468] sm:$0xff] }
 0x106   :  { %v544_v29 = vsel %vm528_vm5, %v331_v50, %v511_v5  ;;  %v596_v23 = vcombine.low %v539_v46, %v540_v39  ;;  %v612_v38 = vcombine.low %v541_v42, %v542_v51  ;;  %v365_v47 = vcombine.high %v357_v28, %v357_v28  ;;  %6396 = vst [vmem:[#allocation7_spill] sm:$0xff] %v5557_v33 }
 0x107   :  { %v613_v54 = vcombine.low %v543_v45, %v544_v29  ;;  %v366_v37 = vcombine.high %v364_v26, %v364_v26  ;;  %v373_v41 = vrot.slane %v357_v28, %v5432_v9  ;;  %v234_v2 = vcombine.high %v5516_v55, %v5516_v55  ;;  %6397 = vst [vmem:[#allocation8_spill] sm:$0xff] %v5566_v57 }
 0x108   :  { %v603_v50 = vrot.slane %v595_v30, %v4837_v32  ;;  %v610_v29 = vrot.slane %v596_v23, %v4837_v32  ;;  %v380_v34 = vrot.slane %v364_v26, %v5432_v9  ;;  %v387_v28 = vrot.slane %v365_v47, %v5432_v9  ;;  %6398 = vst [vmem:[#allocation9_spill] sm:$0xff] %v5571_v25 }
 0x109   :  { %v620_v58 = vrot.slane %v612_v38, %v4837_v32  ;;  %v627_v30 = vrot.slane %v613_v54, %v4837_v32  ;;  %v394_v23 = vrot.slane %v366_v37, %v5432_v9  ;;  %v395_v60 = vcombine.high %v373_v41, %v373_v41 }
 0x10a   :  { %v611_v26 = vcombine.low %v603_v50, %v610_v29  ;;  %v396_v61 = vcombine.high %v380_v34, %v380_v34  ;;  %v397_v36 = vcombine.high %v387_v28, %v387_v28  ;;  %v451_v40 = vrot.slane %v373_v41, %v5450_v19 }
 0x10b   :  { %v628_v49 = vcombine.low %v620_v58, %v627_v30  ;;  %v398_v5 = vcombine.high %v394_v23, %v394_v23  ;;  %v455_v39 = vrot.slane %v387_v28, %v5450_v19  ;;  %v459_v54 = vrot.slane %v395_v60, %v5450_v19 }
 0x10c   :  { %v633_v42 = vrot.slane %v611_v26, 5  ;;  %v467_v51 = vrot.slane %v380_v34, %v5450_v19  ;;  %v463_v38 = vrot.slane %v397_v36, %v5450_v19  ;;  %v241_v47 = vrot.slane %v5516_v55, %v5432_v9 }
 0x10d   :  { %v634_v45 = vrot.slane %v628_v49, 5  ;;  %v248_v37 = vrot.slane %v234_v2, %v5432_v9  ;;  %v471_v50 = vrot.slane %v394_v23, %v5450_v19  ;;  %v475_v29 = vrot.slane %v396_v61, %v5450_v19 }
 0x10e   :  { %v5589_v41 = vsel %vm629_vm6, 0.0, %v633_v42  ;;  %v479_v28 = vrot.slane %v398_v5, %v5450_v19  ;;  %v249_v30 = vcombine.high %v241_v47, %v241_v47  ;;  %v257_v55 = vrot.slane %v241_v47, %v5432_v9 }
 0x10f   :  { %v5595_v58 = vsel %vm629_vm6, %v633_v42, %v634_v45  ;;  %v5598_v34 = vsel %vm629_vm6, %v634_v45, 0.0  ;;  %v250_v60 = vcombine.high %v248_v37, %v248_v37  ;;  %v264_v2 = vrot.slane %v248_v37, %v5432_v9 }
 0x110   :  { %v732_v26 = vrot.slane %v5589_v41, 1  ;;  %v733_v23 = vrot.slane %v5595_v58, 1  ;;  %v271_v61 = vrot.slane %v249_v30, %v5432_v9  ;;  %v742_v36 = vrot.slane %v5589_v41, 2 }
 0x111   :  { %v278_v19 = vrot.slane %v250_v60, %v5432_v9  ;;  %v743_v49 = vrot.slane %v5595_v58, 2  ;;  %v279_v5 = vcombine.high %v257_v55, %v257_v55  ;;  %v280_v42 = vcombine.high %v264_v2, %v264_v2 }
 0x112   :  { %v529_v45 = vsel %vm528_vm5, %v257_v55, %v451_v40  ;;  %v533_v47 = vsel %vm528_vm5, %v264_v2, %v467_v51  ;;  %v281_v46 = vcombine.high %v271_v61, %v271_v61  ;;  %v530_v31 = vsel %vm528_vm5, %v271_v61, %v455_v39 }
 0x113   :  { %v282_v37 = vcombine.high %v278_v19, %v278_v19  ;;  %v534_v57 = vsel %vm528_vm5, %v278_v19, %v471_v50  ;;  %v531_v30 = vsel %vm528_vm5, %v279_v5, %v459_v54  ;;  %v535_v9 = vsel %vm528_vm5, %v280_v42, %v475_v29 }
 0x114   :  { %v561_v60 = vcombine.low %v529_v45, %v530_v31  ;;  %v578_v25 = vcombine.low %v533_v47, %v534_v57  ;;  %v532_v48 = vsel %vm528_vm5, %v281_v46, %v463_v38  ;;  %v734_v40 = vsel %vm680_vm1, %v732_v26, %v733_v23 }
 0x115   :  { %v536_v33 = vsel %vm528_vm5, %v282_v37, %v479_v28  ;;  %v744_v51 = vsel %vm691_vm2, %v742_v36, %v743_v49  ;;  %v562_v55 = vcombine.low %v531_v30, %v532_v48  ;;  %v1025_v54 = vcombine.low %v5343_v53, %v5589_v41 }
 0x116   :  { %v569_v2 = vrot.slane %v561_v60, %v4837_v32  ;;  %v579_v39 = vcombine.low %v535_v9, %v536_v33  ;;  %v586_v50 = vrot.slane %v578_v25, %v4837_v32  ;;  %v1026_v57 = vcombine.high %v5343_v53, %v5589_v41 }
 0x117   :  { %v1027_v31 = vcombine.low %v734_v40, %v744_v51  ;;  %v6385_v46 = vrot.slane %v5598_v34, 1  ;;  %v576_v38 = vrot.slane %v562_v55, %v4837_v32  ;;  %v6386_v48 = vrot.slane %v5598_v34, 2 }
 0x118   :  { %v593_v29 = vrot.slane %v579_v39, %v4837_v32  ;;  %v1028_v28 = vcombine.high %v734_v40, %v744_v51  ;;  %v5629_v33 = vrot.slane %v1025_v54, %v4837_v32  ;;  %v1042_v25 = vrot.slane %v1026_v57, %v4837_v32 }
 0x119   :  { %v5633_v26 = vrot.slane %v1027_v31, %v4837_v32  ;;  %v5638_v53 = vsel %vm680_vm1, %v733_v23, %v6385_v46  ;;  %v577_v61 = vcombine.low %v569_v2, %v576_v38  ;;  %v5643_v36 = vsel %vm691_vm2, %v743_v49, %v6386_v48 }
 0x11a   :  { %v594_v19 = vcombine.low %v586_v50, %v593_v29  ;;  %v5646_v5 = vrot.slane %v1028_v28, %v4837_v32  ;;  %v1115_v45 = vcombine.low %v5348_v7, %v5595_v58  ;;  %v1116_v23 = vcombine.high %v5348_v7, %v5595_v58 }
 0x11b   :  { %v1058_v42 = vcombine.high %v5629_v33, %v5633_v26  ;;  %v1117_v47 = vcombine.low %v5638_v53, %v5643_v36  ;;  %v630_v37 = vrot.slane %v577_v61, 5 }
 0x11c   :  { %v631_v30 = vrot.slane %v594_v19, 5  ;;  %v1060_v49 = vcombine.high %v1042_v25, %v5646_v5  ;;  %v1059_v9 = vcombine.low %v1042_v25, %v5646_v5  ;;  %v5659_v40 = vrot.slane %v1115_v45, %v4837_v32 }
 0x11d   :  { %v3713_v60 = vcombine.low %v1058_v42, %v1042_v25  ;;  %v5662_v51 = vrot.slane %v1116_v23, %v4837_v32  ;;  %v5665_v55 = vrot.slane %v1117_v47, %v4837_v32  ;;  %v5668_v7 = vsel %vm629_vm6, 0.0, %v630_v37 }
 0x11e   :  { %v5671_v2 = vsel %vm629_vm6, %v631_v30, 0.0  ;;  %v5674_v39 = vsel %vm629_vm6, %v630_v37, %v631_v30  ;;  %v3714_v50 = vcombine.high %v5633_v26, %v1059_v9  ;;  %v803_v54 = vcombine.low %v5453_v20, %v5668_v7 }
 0x11f   :  { %v804_v57 = vcombine.high %v5453_v20, %v5668_v7  ;;  %v893_v31 = vcombine.low %v5460_v14, %v5674_v39  ;;  %v894_v38 = vcombine.high %v5460_v14, %v5674_v39  ;;  %v727_v29 = vrot.slane %v5668_v7, 1 }
 0x120   :  { %v728_v28 = vrot.slane %v5674_v39, 1  ;;  %v737_v25 = vrot.slane %v5668_v7, 2  ;;  %v738_v61 = vrot.slane %v5674_v39, 2  ;;  %v813_v19 = vrot.slane %v803_v54, %v4837_v32 }
 0x121   :  { %v820_v42 = vrot.slane %v804_v57, %v4837_v32  ;;  %v903_v20 = vrot.slane %v893_v31, %v4837_v32  ;;  %v910_v45 = vrot.slane %v894_v38, %v4837_v32  ;;  %v730_v47 = vrot.slane %v5671_v2, 1 }
 0x122   :  { %v729_v23 = vsel %vm680_vm1, %v727_v29, %v728_v28  ;;  %v739_v14 = vsel %vm691_vm2, %v737_v25, %v738_v61  ;;  %v740_v37 = vrot.slane %v5671_v2, 2  ;;  %v1424_v30 = vrot.slane %v813_v19, %v4837_v32 }
 0x123   :  { %v1438_v9 = vrot.slane %v820_v42, %v4837_v32  ;;  %v1514_v54 = vrot.slane %v903_v20, %v4837_v32  ;;  %v1528_v57 = vrot.slane %v910_v45, %v4837_v32  ;;  %v805_v46 = vcombine.low %v729_v23, %v739_v14 }
 0x124   :  { %v806_v31 = vcombine.high %v729_v23, %v739_v14  ;;  %v731_v38 = vsel %vm680_vm1, %v728_v28, %v730_v47  ;;  %v741_v29 = vsel %vm691_vm2, %v738_v61, %v740_v37  ;;  %v6399_v20 = vrot.slane %v5036_v24, 4 }
 0x125   :  { %v1446_v48 = vcombine.low %v1424_v30, %v1438_v9  ;;  %v1447_v25 = vcombine.high %v1424_v30, %v1438_v9  ;;  %v1537_v17 = vcombine.high %v1514_v54, %v1528_v57  ;;  %v1536_v35 = vcombine.low %v1514_v54, %v1528_v57 }
 0x126   :  { %v827_v8 = vrot.slane %v805_v46, %v4837_v32  ;;  %v834_v19 = vrot.slane %v806_v31, %v4837_v32  ;;  %v895_v16 = vcombine.low %v731_v38, %v741_v29  ;;  %v896_v42 = vcombine.high %v731_v38, %v741_v29 }
 0x127   :  { %2077 = vmatprep.mubr.f32.mxu0 %v1447_v25  ;;  %v964_v45 = vcombine.low %v6399_v20, %v5671_v2  ;;  %v1618_v23 = vrot.slane %v3713_v60, %v4837_v32  ;;  %v1148_v28 = vcombine.high %v5659_v40, %v5665_v55  ;;  %v3719_v61 = vcombine.low %v1060_v49, %v5659_v40 }
 0x128   :  { %2078 = vmatmul.mubr.f32.vlgmr.msra.gmra.mrb[12].mxu0 %v1446_v48  ;;  %v1431_v14 = vrot.slane %v827_v8, %v4837_v32  ;;  %v1445_v46 = vrot.slane %v834_v19, %v4837_v32  ;;  %v917_v30 = vrot.slane %v895_v16, %v4837_v32  ;;  %v924_v9 = vrot.slane %v896_v42, %v4837_v32 }
 0x129   :  { %v6400_v24 = vpack.c.bf16 %v5358_v52, %v5353_v59  ;;  %2082 = vmatprep.mubr.f32.mxu0 %v1537_v17  ;;  %v972_v60 = vrot.slane %v964_v45, %v4837_v32  ;;  %v3721_v54 = vcombine.low %v1148_v28, %v5662_v51  ;;  %v5722_v49 = vrot.slane %v3719_v61, %v4837_v32 }
 0x12a   :  { %v747_v8 = vrot.slane %v5668_v7, 3  ;;  %v6401_v48 = vpack.c.bf16 %v5371_v63, %v5366_v62  ;;  %v1448_v16 = vcombine.low %v1431_v14, %v1445_v46  ;;  %v1449_v57 = vcombine.high %v1431_v14, %v1445_v46 }
 0x12b   :  { %4445 = vmatpush3.bf16.msra.mxu0 %v6400_v24  ;;  %v1521_v31 = vrot.slane %v917_v30, %v4837_v32  ;;  %v1535_v59 = vrot.slane %v924_v9, %v4837_v32  ;;  %v3711_v52 = vcombine.low %v972_v60, %v5629_v33  ;;  %v1708_v17 = vrot.slane %v3721_v54, %v4837_v32 }
 0x12c   :  { %4447 = vmatprep.subr.bf16.mxu0 %v6401_v48  ;;  %v965_v38 = vcombine.low %v730_v47, %v740_v37  ;;  %v1625_v29 = vrot.slane %v3714_v50, %v4837_v32  ;;  %2083 = vmatmul.mubr.f32.gmra.mrb[14].mxu0 %v1536_v35  ;;  %v1118_v62 = vcombine.high %v5638_v53, %v5643_v36  ;;  %v748_v63 = vrot.slane %v5674_v39, 3 }
 0x12d   :  { %2167 = vmatprep.mubr.f32.mxu1 %v1449_v57  ;;  %v1539_v25 = vcombine.high %v1521_v31, %v1535_v59  ;;  %v1538_v19 = vcombine.low %v1521_v31, %v1535_v59  ;;  %v6402_v42 = vpack.c.bf16 %v5381_v21, %v5376_v0  ;;  %v1604_v33 = vrot.slane %v3711_v52, %v4837_v32 }
 0x12e   :  { %2168 = vmatmul.mubr.f32.vlgmr.msra.gmra.mrb[12].mxu1 %v1448_v16  ;;  %v1717_v47 = vcombine.high %v5722_v49, %v1708_v17  ;;  %v979_v50 = vrot.slane %v965_v38, %v4837_v32  ;;  %v757_v35 = vrot.slane %v5668_v7, 4  ;;  %v6403_v37 = vpack.c.bf16 %v5391_v1, %v5386_v22 }
 0x12f   :  { %4449 = vmatpush3.bf16.msra.mxu0 %v6402_v42  ;;  %2172 = vmatprep.mubr.f32.mxu1 %v1539_v25  ;;  %v1716_v53 = vcombine.low %v5722_v49, %v1708_v17  ;;  %v5748_v36 = vrot.slane %v1118_v62, %v4837_v32  ;;  %v6404_v0 = vrot.slane %v5216_v11, 4  ;;  %v758_v20 = vrot.slane %v5674_v39, 4 }
 0x130   :  { %4451 = vmatprep.subr.bf16.mxu0 %v6403_v37  ;;  %v1627_v45 = vcombine.high %v1604_v33, %v1618_v23  ;;  %v1626_v28 = vcombine.low %v1604_v33, %v1618_v23  ;;  %v3712_v7 = vcombine.low %v979_v50, %v5633_v26  ;;  %v1147_v61 = vcombine.low %v5659_v40, %v5665_v55 }
 0x131   :  { %v1186_v21 = vcombine.low %v6404_v0, %v5598_v34  ;;  %v1150_v22 = vcombine.high %v5662_v51, %v5748_v36  ;;  %v1149_v14 = vcombine.low %v5662_v51, %v5748_v36  ;;  %v749_v11 = vsel %vm702_vm3, %v747_v8, %v748_v63 }
 0x132   :  { %2087 = vmatprep.mubr.f32.mxu0 %v1627_v45  ;;  %v6405_v39 = vpack.c.bf16 %v5404_v6, %v5396_v3  ;;  %v1611_v26 = vrot.slane %v3712_v7, %v4837_v32  ;;  %v3720_v23 = vcombine.high %v5646_v5, %v1147_v61  ;;  %v759_v40 = vsel %vm673_vm4, %v757_v35, %v758_v20  ;;  %v1353_v45 = vld [vmem:[%s6368_s4 + $0x470] sm:$0xff] }
 0x133   :  { %v1194_v1 = vrot.slane %v1186_v21, %v4837_v32  ;;  %v750_v46 = vrot.slane %v5671_v2, 3  ;;  %2088 = vmatmul.mubr.f32.gmra.mrb[16].mxu0 %v1626_v28  ;;  %2173 = vmatmul.mubr.f32.gmra.mrb[14].mxu1 %v1538_v19  ;;  %v3722_v51 = vcombine.high %v5665_v55, %v1149_v14  ;;  %v839_v9 = vcombine.low %v749_v11, %v759_v40  ;;  %v1354_v28 = vld [vmem:[%s6368_s4 + $0x478] sm:$0xff] }
 0x134   :  { %4453 = vmatpush3.bf16.msra.mxu0 %v6405_v39  ;;  %v760_v24 = vrot.slane %v5671_v2, 4  ;;  %2092 = vmatprep.mubr.f32.mxu0 %v1717_v47  ;;  %v1629_v60 = vcombine.high %v1611_v26, %v1625_v29  ;;  %v6406_v3 = vpack.c.bf16 %v5414_v44, %v5409_v43  ;;  %v1628_v6 = vcombine.low %v1611_v26, %v1625_v29 }
 0x135   :  { %v3725_v30 = vcombine.low %v1150_v22, %v1194_v1  ;;  %v1701_v5 = vrot.slane %v3720_v23, %v4837_v32  ;;  %v752_v54 = vrot.slane %v5589_v41, 3  ;;  %v1715_v8 = vrot.slane %v3722_v51, %v4837_v32 }
 0x136   :  { %4455 = vmatprep.subr.bf16.mxu0 %v6406_v3  ;;  %v840_v48 = vcombine.high %v749_v11, %v759_v40  ;;  %v847_v55 = vrot.slane %v839_v9, %v4837_v32  ;;  %2177 = vmatprep.mubr.f32.mxu1 %v1629_v60  ;;  %v6407_v2 = vpack.c.bf16 %v5424_v10, %v5419_v56  ;;  %v6408_v43 = vrot.slane %v5598_v34, 2  ;;  %v6416_v40 = vld [vmem:[#allocation5_spill] sm:$0xff] }
 0x137   :  { %v1764_v49 = vrot.slane %v3725_v30, %v4837_v32  ;;  %v6409_v44 = vrot.slane %v5598_v34, 1  ;;  %v751_v57 = vsel %vm702_vm3, %v748_v63, %v750_v46  ;;  %v761_v31 = vsel %vm673_vm4, %v758_v20, %v760_v24  ;;  %2093 = vmatmul.mubr.f32.gmra.mrb[18].mxu0 %v1716_v53  ;;  %2178 = vmatmul.mubr.f32.gmra.mrb[16].mxu1 %v1628_v6 }
 0x138   :  { %4457 = vmatpush3.bf16.msra.mxu0 %v6407_v2  ;;  %v753_v59 = vrot.slane %v5595_v58, 3  ;;  %v1719_v17 = vcombine.high %v1701_v5, %v1715_v8  ;;  %v1718_v38 = vcombine.low %v1701_v5, %v1715_v8  ;;  %v762_v29 = vrot.slane %v5589_v41, 4 }
 0x139   :  { %v1187_v16 = vcombine.low %v6409_v44, %v6408_v43  ;;  %v1772_v52 = vcombine.high %v1764_v49, %v1764_v49  ;;  %v6410_v56 = vpack.c.bf16 %v5437_v13, %v5429_v12  ;;  %v854_v10 = vrot.slane %v840_v48, %v4837_v32  ;;  %v6419_v44 = vld [vmem:[#allocation7_spill] sm:$0xff] }
 0x13a   :  { %v855_v25 = vcombine.high %v847_v55, %v847_v55  ;;  %v929_v62 = vcombine.low %v751_v57, %v761_v31  ;;  %2182 = vmatprep.mubr.f32.mxu1 %v1719_v17  ;;  %v930_v63 = vcombine.high %v751_v57, %v761_v31  ;;  %v754_v42 = vsel %vm702_vm3, %v752_v54, %v753_v59  ;;  %v6422_v17 = vld [vmem:[#allocation9_spill] sm:$0xff] }
 0x13b   :  { %4459 = vmatprep.subr.bf16.mxu0 %v6410_v56  ;;  %v1201_v19 = vrot.slane %v1187_v16, %v4837_v32  ;;  %2097 = vmatprep.mubr.f32.mxu0 %v1772_v52  ;;  %v763_v33 = vrot.slane %v5595_v58, 4  ;;  %v981_v47 = vcombine.low %v750_v46, %v760_v24  ;;  %v6411_v41 = vpack.c.bf16 %v5447_v18, %v5442_v15  ;;  %v6417_v46 = vld [vmem:[#allocation4_spill] sm:$0xff]  ;;  %v6420_v16 = vld [vmem:[#allocation6_spill] sm:$0xff] }
 0x13c   :  { %v856_v12 = vcombine.high %v854_v10, %v854_v10  ;;  %v1450_v13 = vcombine.low %v847_v55, %v855_v25  ;;  %v937_v35 = vrot.slane %v929_v62, %v4837_v32  ;;  %2098 = vmatmul.mubr.f32.gmra.mrb[20].mxu0 %v1764_v49  ;;  %2183 = vmatmul.mubr.f32.gmra.mrb[18].mxu1 %v1718_v38  ;;  %v755_v58 = vrot.slane %v5598_v34, 3  ;;  %v6423_v38 = vld [vmem:[#allocation8_spill] sm:$0xff] }
 0x13d   :  { %4461 = vmatpush3.bf16.msra.mxu0 %v6411_v41  ;;  %v1202_v50 = vcombine.low %v1194_v1, %v1201_v19  ;;  %v944_v37 = vrot.slane %v930_v63, %v4837_v32  ;;  %v764_v53 = vsel %vm673_vm4, %v762_v29, %v763_v33  ;;  %v988_v0 = vrot.slane %v981_v47, %v4837_v32 }
 0x13e   :  { %v1451_v21 = vcombine.low %v854_v10, %v856_v12  ;;  %v1458_v20 = vrot.slane %v1450_v13, %v4837_v32  ;;  %v6412_v18 = vpack.c.bf16 %v5470_v4, %v5465_v27  ;;  %v945_v7 = vcombine.high %v937_v35, %v937_v35  ;;  %v6413_v27 = vld [vmem:[#allocation3_spill] sm:$0xff]  ;;  %v6414_v4 = vld [vmem:[#allocation2_spill] sm:$0xff] }
 0x13f   :  { %v3726_v15 = vcombine.high %v5748_v36, %v1202_v50  ;;  %v946_v61 = vcombine.high %v944_v37, %v944_v37  ;;  %v1061_v22 = vcombine.low %v754_v42, %v764_v53  ;;  %v1062_v1 = vcombine.high %v754_v42, %v764_v53 }
 0x140   :  { %4463 = vmatprep.subr.bf16.mxu0 %v6412_v18  ;;  %v756_v14 = vsel %vm702_vm3, %v753_v59, %v755_v58  ;;  %v1465_v36 = vrot.slane %v1451_v21, %v4837_v32  ;;  %v6415_v39 = vpack.c.bf16 %v6413_v27, %v6414_v4  ;;  %v1540_v26 = vcombine.low %v937_v35, %v945_v7  ;;  %v3862_v7 = vpop.f32.mrb[2].mxu1 }
 0x141   :  { %v1771_v11 = vrot.slane %v3726_v15, %v4837_v32  ;;  %v765_v23 = vrot.slane %v5598_v34, 4  ;;  %v6418_v30 = vpack.c.bf16 %v6416_v40, %v6417_v46  ;;  %v4472_v51 = vpack.c.bf16 %v1354_v28, %v1353_v45  ;;  %v3706_v45 = vld [vmem:[%s6371_s5] ss:$0 sm:$0xff] }
 0x142   :  { %4465 = vmatpush3.bf16.msra.mxu0 %v6415_v39  ;;  %v1541_v9 = vcombine.low %v944_v37, %v946_v61  ;;  %v1069_v24 = vrot.slane %v1061_v22, %v4837_v32  ;;  %v1076_v60 = vrot.slane %v1062_v1, %v4837_v32  ;;  %v1466_v3 = vcombine.low %v1458_v20, %v1465_v36  ;;  %v3863_v61 = vpop.f32.mrb[3].mxu1 }
 0x143   :  { %4467 = vmatprep.subr.bf16.mxu0 %v6418_v30  ;;  %v1467_v6 = vcombine.high %v1458_v20, %v1465_v36  ;;  %v1773_v5 = vcombine.high %v1771_v11, %v1771_v11  ;;  %v1548_v54 = vrot.slane %v1540_v26, %v4837_v32  ;;  %v766_v34 = vsel %vm673_vm4, %v763_v33, %v765_v23  ;;  %v3865_v27 = vpop.f32.mrb[4].mxu1 }
 0x144   :  { %v1555_v49 = vrot.slane %v1541_v9, %v4837_v32  ;;  %v1077_v8 = vcombine.high %v1069_v24, %v1069_v24  ;;  %v1630_v48 = vcombine.low %v988_v0, %v1069_v24  ;;  %v1078_v55 = vcombine.high %v1076_v60, %v1076_v60  ;;  %v3866_v39 = vpop.f32.mrb[5].mxu1 }
 0x145   :  { %2257 = vmatprep.mubr.f32.mxu0 %v1467_v6  ;;  %2187 = vmatprep.mubr.f32.mxu1 %v1773_v5  ;;  %v1151_v2 = vcombine.low %v756_v14, %v766_v34  ;;  %v1152_v43 = vcombine.high %v756_v14, %v766_v34  ;;  %v6421_v57 = vpack.c.bf16 %v6419_v44, %v6420_v16 }
 0x146   :  { %2188 = vmatmul.mubr.f32.gmra.mrb[20].mxu1 %v1771_v11  ;;  %v1557_v31 = vcombine.high %v1548_v54, %v1555_v49  ;;  %v1556_v59 = vcombine.low %v1548_v54, %v1555_v49  ;;  %v1631_v52 = vcombine.low %v1077_v8, %v1076_v60  ;;  %v6424_v29 = vpack.c.bf16 %v6422_v17, %v6423_v38  ;;  %v2849_v17 = vld [vmem:[%s6372_s8 + $0x80] sm:$0xff]  ;;  %v2850_v38 = vld [vmem:[%s6372_s8 + $0x88] sm:$0xff] }
 0x147   :  { %4469 = vmatpush3.bf16.msra.mxu0 %v6421_v57  ;;  %v1159_v56 = vrot.slane %v1151_v2, %v4837_v32  ;;  %v1166_v10 = vrot.slane %v1152_v43, %v4837_v32  ;;  %v1203_v25 = vcombine.low %v755_v58, %v765_v23  ;;  %v1638_v19 = vrot.slane %v1630_v48, %v4837_v32  ;;  %v3815_v58 = vpop.f32.mrb[2].mxu0 }
 0x148   :  { %4471 = vmatprep.subr.bf16.mxu0 %v6424_v29  ;;  %v1645_v62 = vrot.slane %v1631_v52, %v4837_v32  ;;  %v3816_v21 = vpop.f32.mrb[3].mxu0  ;;  %v3864_v22 = vadd.f32 %v3863_v61, %v3862_v7  ;;  %v3867_v26 = vadd.f32 %v3866_v39, %v3865_v27  ;;  %v2833_v29 = vld [vmem:[%s6372_s8] sm:$0xff]  ;;  %v2838_v61 = vld [vmem:[%s6372_s8 + $0x28] sm:$0xff]  ;;  %v2855_v39 = vld [vmem:[%s6372_s8 + $0xb0] sm:$0xff] }
 0x149   :  { %v1167_v63 = vcombine.high %v1159_v56, %v1159_v56  ;;  %v1720_v42 = vcombine.low %v1078_v55, %v1159_v56  ;;  %v1168_v33 = vcombine.high %v1166_v10, %v1166_v10  ;;  %v1210_v47 = vrot.slane %v1203_v25, %v4837_v32  ;;  %v3818_v14 = vpop.f32.mrb[4].mxu0  ;;  %v2881_v25 = vld [vmem:[%s6372_s8 + $0x180] sm:$0xff] }
 0x14a   :  { %v1647_v41 = vcombine.high %v1638_v19, %v1645_v62  ;;  %v1646_v12 = vcombine.low %v1638_v19, %v1645_v62  ;;  %v3817_v20 = vadd.f32 %v3816_v21, %v3815_v58  ;;  %v3819_v36 = vpop.f32.mrb[5].mxu0  ;;  %v4474_v56 = vpack.c.bf16 %v2850_v38, %v2849_v17  ;;  %v2882_v19 = vld [vmem:[%s6372_s8 + $0x188] sm:$0xff]  ;;  %v2867_v58 = vld [vmem:[%s6372_s8 + $0x110] sm:$0xff]  ;;  %v2837_v7 = vld [vmem:[%s6372_s8 + $0x20] sm:$0xff] }
 0x14b   :  { %4473 = vmatpush3.bf16.msra.mxu0 %v4472_v51  ;;  %v1721_v13 = vcombine.low %v1167_v63, %v1166_v10  ;;  %v1728_v50 = vrot.slane %v1720_v42, %v4837_v32  ;;  %v1774_v35 = vcombine.low %v1168_v33, %v1210_v47  ;;  %v3820_v11 = vadd.f32 %v3819_v36, %v3818_v14  ;;  %v3821_v40 = vpop.f32.mrb[6].mxu0  ;;  %v3868_v51 = vpop.f32.mrb[6].mxu1  ;;  %v2834_v10 = vld [vmem:[%s6372_s8 + $0x8] sm:$0xff]  ;;  %v2865_v42 = vld [vmem:[%s6372_s8 + $0x100] sm:$0xff]  ;;  %v2851_v47 = vld [vmem:[%s6372_s8 + $0x90] sm:$0xff] }
 0x14c   :  { %v1900_v28 = vadd.f32 %v3817_v20, %v3706_v45  ;;  %v3822_v46 = vpop.f32.mrb[7].mxu0  ;;  %v3869_v24 = vpop.f32.mrb[7].mxu1  ;;  %v4476_v62 = vpack.c.bf16 %v2834_v10, %v2833_v29  ;;  %v4506_v63 = vpack.c.bf16 %v2882_v19, %v2881_v25  ;;  %v2866_v33 = vld [vmem:[%s6372_s8 + $0x108] sm:$0xff]  ;;  %4475 = vmatprep.subr.bf16.mxu1 %v4474_v56  ;;  %v2868_v20 = vld [vmem:[%s6372_s8 + $0x118] sm:$0xff]  ;;  %v2869_v36 = vld [vmem:[%s6372_s8 + $0x120] sm:$0xff]  ;;  %v4484_v27 = vpack.c.bf16 %v2838_v61, %v2837_v7 }
 0x14d   :  { %v1735_v37 = vrot.slane %v1721_v13, %v4837_v32  ;;  %v1781_v15 = vrot.slane %v1774_v35, %v4837_v32  ;;  %v1905_v4 = vadd.f32 %v3820_v11, %v3706_v45  ;;  %v3823_v30 = vadd.f32 %v3822_v46, %v3821_v40  ;;  %v3824_v6 = vpop.f32.mrb[8].mxu0  ;;  %v3871_v54 = vpop.f32.mrb[8].mxu1  ;;  %v2835_v13 = vld [vmem:[%s6372_s8 + $0x10] sm:$0xff]  ;;  %v2886_v14 = vld [vmem:[%s6372_s8 + $0x1a8] sm:$0xff]  ;;  %v2860_v38 = vld [vmem:[%s6372_s8 + $0xd8] sm:$0xff] }
 0x14e   :  { %2258 = vmatmul.mubr.f32.vlgmr.msra.gmra.mrb[22].mxu0 %v1466_v3  ;;  %v5849_v1 = vadd.f32 %v3864_v22, %v1900_v28  ;;  %v3870_v60 = vadd.f32 %v3869_v24, %v3868_v51  ;;  %v3825_v5 = vpop.f32.mrb[9].mxu0  ;;  %v3872_v8 = vpop.f32.mrb[9].mxu1  ;;  %4477 = vmatpush3.bf16.msra.mxu1 %v4476_v62  ;;  %v2885_v22 = vld [vmem:[%s6372_s8 + $0x1a0] sm:$0xff]  ;;  %v2870_v11 = vld [vmem:[%s6372_s8 + $0x128] sm:$0xff]  ;;  %v2839_v40 = vld [vmem:[%s6372_s8 + $0x30] sm:$0xff] }
 0x14f   :  { %2262 = vmatprep.mubr.f32.mxu0 %v1557_v31  ;;  %v1737_v53 = vcombine.high %v1728_v50, %v1735_v37  ;;  %v1736_v0 = vcombine.low %v1728_v50, %v1735_v37  ;;  %v1782_v18 = vcombine.high %v1781_v15, %v1781_v15  ;;  %v5851_v23 = vadd.f32 %v3867_v26, %v1905_v4  ;;  %v3827_v55 = vpop.f32.mrb[10].mxu0  ;;  %v3874_v16 = vpop.f32.mrb[10].mxu1  ;;  %v2836_v50 = vld [vmem:[%s6372_s8 + $0x18] sm:$0xff]  ;;  %v2859_v17 = vld [vmem:[%s6372_s8 + $0xd0] sm:$0xff] }
 0x150   :  { %v1910_v9 = vadd.f32 %v3823_v30, %v3706_v45  ;;  %v3826_v49 = vadd.f32 %v3825_v5, %v3824_v6  ;;  %v3873_v48 = vadd.f32 %v3872_v8, %v3871_v54  ;;  %v3828_v2 = vpop.f32.mrb[11].mxu0  ;;  %v3875_v31 = vpop.f32.mrb[11].mxu1  ;;  %4507 = vmatprep.subr.bf16.mxu0 %v4506_v63  ;;  %v4480_v37 = vpack.c.bf16 %v2836_v50, %v2835_v13  ;;  %v2856_v26 = vld [vmem:[%s6372_s8 + $0xb8] sm:$0xff]  ;;  %v2871_v6 = vld [vmem:[%s6372_s8 + $0x130] sm:$0xff]  ;;  %v2857_v54 = vld [vmem:[%s6372_s8 + $0xc0] sm:$0xff] }
 0x151   :  { %v3829_v44 = vadd.f32 %v3828_v2, %v3827_v55  ;;  %v4514_v4 = vpack.c.bf16 %v2886_v14, %v2885_v22  ;;  %v4516_v46 = vpack.c.bf16 %v2870_v11, %v2869_v36  ;;  %v4486_v30 = vpack.c.bf16 %v2856_v26, %v2855_v39  ;;  %v2840_v51 = vld [vmem:[%s6372_s8 + $0x38] sm:$0xff]  ;;  %v2891_v29 = vld [vmem:[%s6372_s8 + $0x1d0] sm:$0xff]  ;;  %v2893_v50 = vld [vmem:[%s6372_s8 + $0x1e0] sm:$0xff] }
 0x152   :  { %2263 = vmatmul.mubr.f32.gmra.mrb[24].mxu0 %v1556_v59  ;;  %v5853_v3 = vadd.f32 %v3870_v60, %v1910_v9  ;;  %v1915_v34 = vadd.f32 %v3826_v49, %v3706_v45  ;;  %v3876_v59 = vadd.f32 %v3875_v31, %v3874_v16  ;;  %v2887_v9 = vld [vmem:[%s6372_s8 + $0x1b0] sm:$0xff]  ;;  %v2888_v24 = vld [vmem:[%s6372_s8 + $0x1b8] sm:$0xff]  ;;  %v2858_v49 = vld [vmem:[%s6372_s8 + $0xc8] sm:$0xff]  ;;  %v4488_v8 = vpack.c.bf16 %v2840_v51, %v2839_v40 }
 0x153   :  { %2267 = vmatprep.mubr.f32.mxu0 %v1647_v41  ;;  %v1920_v57 = vadd.f32 %v3829_v44, %v3706_v45  ;;  %v4508_v41 = vpack.c.bf16 %v2866_v33, %v2865_v42  ;;  %v4512_v45 = vpack.c.bf16 %v2868_v20, %v2867_v58  ;;  %v4518_v60 = vpack.c.bf16 %v2888_v24, %v2887_v9  ;;  %v2872_v5 = vld [vmem:[%s6372_s8 + $0x138] sm:$0xff]  ;;  %v2841_v44 = vld [vmem:[%s6372_s8 + $0x40] sm:$0xff]  ;;  %v2842_v16 = vld [vmem:[%s6372_s8 + $0x48] sm:$0xff] }
 0x154   :  { %v5855_v43 = vadd.f32 %v3873_v48, %v1915_v34  ;;  %v2889_v48 = vld [vmem:[%s6372_s8 + $0x1c0] sm:$0xff]  ;;  %v2890_v34 = vld [vmem:[%s6372_s8 + $0x1c8] sm:$0xff]  ;;  %v4520_v55 = vpack.c.bf16 %v2872_v5, %v2871_v6  ;;  %v4490_v2 = vpack.c.bf16 %v2858_v49, %v2857_v54  ;;  %v2892_v56 = vld [vmem:[%s6372_s8 + $0x1d8] sm:$0xff]  ;;  %v4492_v10 = vpack.c.bf16 %v2842_v16, %v2841_v44 }
 0x155   :  { %v5857_v52 = vadd.f32 %v3876_v59, %v1920_v57  ;;  %4509 = vmatpush3.bf16.msra.mxu0 %v4508_v41  ;;  %v2873_v57 = vld [vmem:[%s6372_s8 + $0x140] sm:$0xff]  ;;  %v4522_v31 = vpack.c.bf16 %v2890_v34, %v2889_v48  ;;  %v2874_v59 = vld [vmem:[%s6372_s8 + $0x148] sm:$0xff]  ;;  %v4494_v19 = vpack.c.bf16 %v2860_v38, %v2859_v17  ;;  %v2843_v62 = vld [vmem:[%s6372_s8 + $0x50] sm:$0xff]  ;;  %v4526_v33 = vpack.c.bf16 %v2892_v56, %v2891_v29 }
 0x156   :  { %2268 = vmatmul.mubr.f32.gmra.mrb[26].mxu0 %v1646_v12  ;;  %v2852_v12 = vld [vmem:[%s6372_s8 + $0x98] sm:$0xff]  ;;  %v4524_v25 = vpack.c.bf16 %v2874_v59, %v2873_v57  ;;  %v2875_v42 = vld [vmem:[%s6372_s8 + $0x150] sm:$0xff]  ;;  %v2861_v41 = vld [vmem:[%s6372_s8 + $0xe0] sm:$0xff] }
 0x157   :  { %2272 = vmatprep.mubr.f32.mxu0 %v1737_v53  ;;  %v4478_v35 = vpack.c.bf16 %v2852_v12, %v2851_v47  ;;  %v2883_v53 = vld [vmem:[%s6372_s8 + $0x190] sm:$0xff]  ;;  %v2844_v63 = vld [vmem:[%s6372_s8 + $0x58] sm:$0xff]  ;;  %v2862_v12 = vld [vmem:[%s6372_s8 + $0xe8] sm:$0xff] }
 0x158   :  { %v2876_v47 = vld [vmem:[%s6372_s8 + $0x158] sm:$0xff]  ;;  %v2845_v20 = vld [vmem:[%s6372_s8 + $0x60] sm:$0xff]  ;;  %v2863_v7 = vld [vmem:[%s6372_s8 + $0xf0] sm:$0xff] }
 0x159   :  { %4479 = vmatprep.subr.bf16.mxu1 %v4478_v35  ;;  %v2894_v35 = vld [vmem:[%s6372_s8 + $0x1e8] sm:$0xff]  ;;  %v4528_v58 = vpack.c.bf16 %v2876_v47, %v2875_v42  ;;  %v2864_v61 = vld [vmem:[%s6372_s8 + $0xf8] sm:$0xff]  ;;  %v2895_v36 = vld [vmem:[%s6372_s8 + $0x1f0] sm:$0xff] }
 0x15a   :  { %2273 = vmatmul.mubr.f32.gmra.mrb[28].mxu0 %v1736_v0  ;;  %v2884_v0 = vld [vmem:[%s6372_s8 + $0x198] sm:$0xff]  ;;  %4481 = vmatpush3.bf16.msra.mxu1 %v4480_v37 }
 0x15b   :  { %2277 = vmatprep.mubr.f32.mxu0 %v1782_v18  ;;  %v4510_v21 = vpack.c.bf16 %v2884_v0, %v2883_v53  ;;  %v2854_v18 = vld [vmem:[%s6372_s8 + $0xa8] sm:$0xff]  ;;  %v4496_v53 = vpack.c.bf16 %v2844_v63, %v2843_v62  ;;  %v2896_v11 = vld [vmem:[%s6372_s8 + $0x1f8] sm:$0xff] }
 0x15c   :  { %v2848_v51 = vld [vmem:[%s6372_s8 + $0x78] sm:$0xff]  ;;  %v4534_v24 = vpack.c.bf16 %v2896_v11, %v2895_v36 }
 0x15d   :  { %4511 = vmatprep.subr.bf16.mxu0 %v4510_v21  ;;  %v4498_v21 = vpack.c.bf16 %v2862_v12, %v2861_v41  ;;  %v2880_v6 = vld [vmem:[%s6372_s8 + $0x178] sm:$0xff] }
 0x15e   :  { %2278 = vmatmul.mubr.f32.gmra.mrb[30].mxu0 %v1781_v15  ;;  %v2853_v15 = vld [vmem:[%s6372_s8 + $0xa0] sm:$0xff] }
 0x15f   :  { %v4482_v28 = vpack.c.bf16 %v2854_v18, %v2853_v15  ;;  %4513 = vmatpush3.bf16.msra.mxu0 %v4512_v45  ;;  %v2846_v15 = vld [vmem:[%s6372_s8 + $0x68] sm:$0xff]  ;;  %v2877_v18 = vld [vmem:[%s6372_s8 + $0x160] sm:$0xff]  ;;  %v4530_v45 = vpack.c.bf16 %v2894_v35, %v2893_v50 }
 0x160   :  { %4515 = vmatprep.subr.bf16.mxu0 %v4514_v4  ;;  %v4500_v39 = vpack.c.bf16 %v2846_v15, %v2845_v20 }
 0x161   :  { %4483 = vmatprep.subr.bf16.mxu1 %v4482_v28  ;;  %v2878_v28 = vld [vmem:[%s6372_s8 + $0x168] sm:$0xff] }
 0x162   :  { %4485 = vmatpush3.bf16.msra.mxu1 %v4484_v27 }
 0x163   :  { %4517 = vmatpush3.bf16.msra.mxu0 %v4516_v46  ;;  %4487 = vmatprep.subr.bf16.mxu1 %v4486_v30  ;;  %v4532_v46 = vpack.c.bf16 %v2878_v28, %v2877_v18  ;;  %v4502_v30 = vpack.c.bf16 %v2864_v61, %v2863_v7 }
 0x164   :  { %4519 = vmatprep.subr.bf16.mxu0 %v4518_v60  ;;  %v2879_v60 = vld [vmem:[%s6372_s8 + $0x170] sm:$0xff] }
 0x165   :  { %v4536_v34 = vpack.c.bf16 %v2880_v6, %v2879_v60 }
 0x166   :  { %4489 = vmatpush3.bf16.msra.mxu1 %v4488_v8 }
 0x167   :  { %4521 = vmatpush3.bf16.msra.mxu0 %v4520_v55  ;;  %4491 = vmatprep.subr.bf16.mxu1 %v4490_v2 }
 0x168   :  { %4523 = vmatprep.subr.bf16.mxu0 %v4522_v31 }
 0x16a   :  { %4493 = vmatpush3.bf16.msra.mxu1 %v4492_v10 }
 0x16b   :  { %4525 = vmatpush3.bf16.msra.mxu0 %v4524_v25  ;;  %4495 = vmatprep.subr.bf16.mxu1 %v4494_v19 }
 0x16c   :  { %4527 = vmatprep.subr.bf16.mxu0 %v4526_v33 }
 0x16e   :  { %4497 = vmatpush3.bf16.msra.mxu1 %v4496_v53 }
 0x16f   :  { %4529 = vmatpush3.bf16.msra.mxu0 %v4528_v58  ;;  %4499 = vmatprep.subr.bf16.mxu1 %v4498_v21 }
 0x170   :  { %4531 = vmatprep.subr.bf16.mxu0 %v4530_v45 }
 0x172   :  { %4501 = vmatpush3.bf16.msra.mxu1 %v4500_v39 }
 0x173   :  { %4533 = vmatpush3.bf16.msra.mxu0 %v4532_v46  ;;  %4503 = vmatprep.subr.bf16.mxu1 %v4502_v30 }
 0x174   :  { %4535 = vmatprep.subr.bf16.mxu0 %v4534_v24 }
 0x177   :  { %4537 = vmatpush3.bf16.msra.mxu0 %v4536_v34 }
 0x1fb   :  { %v3909_v13 = vpop.f32.mrb[12].mxu0 }
 0x1fc   :  { %v3910_v37 = vpop.f32.mrb[13].mxu0 }
 0x1fd   :  { %v3911_v0 = vadd.f32 %v3910_v37, %v3909_v13 }
 0x1ff   :  { %v2080_v22 = vadd.f32 %v3911_v0, %v5849_v1  ;;  %v3912_v14 = vpop.f32.mrb[14].mxu0  ;;  %v2847_v1 = vld [vmem:[%s6372_s8 + $0x70] sm:$0xff] }
 0x200   :  { %v3913_v27 = vpop.f32.mrb[15].mxu0  ;;  %v4504_v49 = vpack.c.bf16 %v2848_v51, %v2847_v1 }
 0x201   :  { %v3956_v4 = vpop.f32.mrb[12].mxu1  ;;  %v3914_v26 = vadd.f32 %v3913_v27, %v3912_v14 }
 0x202   :  { %v3957_v40 = vpop.f32.mrb[13].mxu1  ;;  %4505 = vmatpush3.bf16.msra.mxu1 %v4504_v49 }
 0x203   :  { %v3958_v9 = vadd.f32 %v3957_v40, %v3956_v4  ;;  %v2085_v5 = vadd.f32 %v3914_v26, %v5851_v23  ;;  %v4573_v23 = vmov 0.0|0.0  }
 0x204   :  { %4538 = vmatprep.subr.bf16.mxu1 %v4573_v23 }
 0x205   :  { %v2170_v54 = vadd.f32 %v3958_v9, %v2080_v22 }
 0x206   :  { %v3915_v8 = vpop.f32.mrb[16].mxu0  ;;  %v3959_v48 = vpop.f32.mrb[14].mxu1 }
 0x207   :  { %v3916_v55 = vpop.f32.mrb[17].mxu0  ;;  %v3960_v2 = vpop.f32.mrb[15].mxu1 }
 0x208   :  { %v3917_v44 = vadd.f32 %v3916_v55, %v3915_v8  ;;  %v3961_v16 = vadd.f32 %v3960_v2, %v3959_v48 }
 0x20a   :  { %v2090_v57 = vadd.f32 %v3917_v44, %v5853_v3  ;;  %v2175_v31 = vadd.f32 %v3961_v16, %v2085_v5  ;;  %v3918_v59 = vpop.f32.mrb[18].mxu0  ;;  %v3962_v17 = vpop.f32.mrb[16].mxu1 }
 0x20b   :  { %v3919_v38 = vpop.f32.mrb[19].mxu0  ;;  %v3963_v29 = vpop.f32.mrb[17].mxu1 }
 0x20c   :  { %v3920_v56 = vadd.f32 %v3919_v38, %v3918_v59  ;;  %v3964_v10 = vadd.f32 %v3963_v29, %v3962_v17 }
 0x20e   :  { %v2095_v25 = vadd.f32 %v3920_v56, %v5855_v43  ;;  %v2180_v19 = vadd.f32 %v3964_v10, %v2090_v57 }
 0x20f   :  { %v3921_v62 = vpop.f32.mrb[20].mxu0  ;;  %v3965_v63 = vpop.f32.mrb[18].mxu1 }
 0x210   :  { %v3922_v42 = vpop.f32.mrb[21].mxu0  ;;  %v3966_v33 = vpop.f32.mrb[19].mxu1 }
 0x211   :  { %v3923_v47 = vadd.f32 %v3922_v42, %v3921_v62  ;;  %v3967_v3 = vadd.f32 %v3966_v33, %v3965_v63 }
 0x213   :  { %v2100_v41 = vadd.f32 %v3923_v47, %v5857_v52  ;;  %v2185_v12 = vadd.f32 %v3967_v3, %v2095_v25 }
 0x219   :  { %v3968_v13 = vpop.f32.mrb[20].mxu1 }
 0x21a   :  { %v3969_v50 = vpop.f32.mrb[21].mxu1 }
 0x21b   :  { %v3970_v35 = vadd.f32 %v3969_v50, %v3968_v13  ;;  %v3727_v50 = vld [vmem:[%s6373_s6] ss:$0 sm:$0xff] }
 0x21d   :  { %v2190_v37 = vadd.f32 %v3970_v35, %v2100_v41 }
 0x221   :  { %v4003_v53 = vpop.f32.mrb[22].mxu0 }
 0x222   :  { %v4004_v0 = vpop.f32.mrb[23].mxu0 }
 0x223   :  { %v4005_v58 = vadd.f32 %v4004_v0, %v4003_v53 }
 0x225   :  { %v2260_v21 = vadd.f32 %v4005_v58, %v2170_v54  ;;  %v4006_v20 = vpop.f32.mrb[24].mxu0 }
 0x226   :  { %v4007_v43 = vpop.f32.mrb[25].mxu0 }
 0x227   :  { %v4008_v15 = vadd.f32 %v4007_v43, %v4006_v20  ;;  %v2295_v7 = vmul.f32 %v2260_v21, %v2260_v21  ;;  %v6068_v20 = vld [vmem:[%s6372_s8 + $0x200] sm:$0xff] }
 0x229   :  { %v2265_v18 = vadd.f32 %v4008_v15, %v2175_v31  ;;  %v4009_v45 = vpop.f32.mrb[26].mxu0 }
 0x22a   :  { %v4010_v28 = vpop.f32.mrb[27].mxu0 }
 0x22b   :  { %v2283_v61 = vadd.f32 %v2265_v18, %v2260_v21  ;;  %v2296_v22 = vmul.f32 %v2265_v18, %v2265_v18  ;;  %v4011_v14 = vadd.f32 %v4010_v28, %v4009_v45  ;;  %v6073_v28 = vld [vmem:[%s6372_s8 + $0x208] sm:$0xff] }
 0x22d   :  { %v2300_v52 = vadd.f32 %v2296_v22, %v2295_v7  ;;  %v2270_v36 = vadd.f32 %v4011_v14, %v2180_v19  ;;  %v4012_v11 = vpop.f32.mrb[28].mxu0  ;;  %v6078_v7 = vld [vmem:[%s6372_s8 + $0x210] sm:$0xff]  ;;  %v6088_v14 = vld [vmem:[%s6372_s8 + $0x220] sm:$0xff] }
 0x22e   :  { %v4013_v27 = vpop.f32.mrb[29].mxu0 }
 0x22f   :  { %v2284_v4 = vadd.f32 %v2283_v61, %v2270_v36  ;;  %v2297_v39 = vmul.f32 %v2270_v36, %v2270_v36  ;;  %v4014_v26 = vadd.f32 %v4013_v27, %v4012_v11  ;;  %v6083_v61 = vld [vmem:[%s6372_s8 + $0x218] sm:$0xff] }
 0x231   :  { %v2301_v40 = vadd.f32 %v2300_v52, %v2297_v39  ;;  %v2275_v46 = vadd.f32 %v4014_v26, %v2185_v12  ;;  %v4015_v30 = vpop.f32.mrb[30].mxu0  ;;  %v6093_v52 = vld [vmem:[%s6372_s8 + $0x228] sm:$0xff]  ;;  %v6103_v26 = vld [vmem:[%s6372_s8 + $0x238] sm:$0xff] }
 0x232   :  { %v4016_v1 = vpop.f32.mrb[31].mxu0 }
 0x233   :  { %v2285_v51 = vadd.f32 %v2284_v4, %v2275_v46  ;;  %v2298_v9 = vmul.f32 %v2275_v46, %v2275_v46  ;;  %v4017_v24 = vadd.f32 %v4016_v1, %v4015_v30  ;;  %v4539_v1 = vpack.c.bf16 %v6073_v28, %v6068_v20 }
 0x235   :  { %v2302_v60 = vadd.f32 %v2301_v40, %v2298_v9  ;;  %v2280_v6 = vadd.f32 %v4017_v24, %v2190_v37  ;;  %v6108_v40 = vld [vmem:[%s6372_s8 + $0x240] sm:$0xff] }
 0x237   :  { %v2286_v5 = vsel %vm673_vm4, %v2280_v6, 0.0  ;;  %v2299_v54 = vmul.f32 %v2280_v6, %v2280_v6 }
 0x238   :  { %v2287_v49 = vadd.f32 %v2286_v5, %v2285_v51  ;;  %v4542_v51 = vpack.c.bf16 %v6083_v61, %v6078_v7 }
 0x239   :  { %v2303_v8 = vsel %vm673_vm4, %v2299_v54, 0.0  ;;  %v4545_v54 = vpack.c.bf16 %v6093_v52, %v6088_v14 }
 0x23a   :  { %v2288_v48 = vrot.slane %v2287_v49, 4  ;;  %v2304_v34 = vadd.f32 %v2303_v8, %v2302_v60 }
 0x23c   :  { %v2289_v55 = vadd.f32 %v2288_v48, %v2287_v49  ;;  %v2305_v2 = vrot.slane %v2304_v34, 4 }
 0x23e   :  { %v2290_v44 = vrot.slane %v2289_v55, 2  ;;  %v2306_v16 = vadd.f32 %v2305_v2, %v2304_v34 }
 0x240   :  { %v2291_v57 = vadd.f32 %v2290_v44, %v2289_v55  ;;  %v2307_v31 = vrot.slane %v2306_v16, 2 }
 0x242   :  { %v2292_v59 = vrot.slane %v2291_v57, 1  ;;  %v2308_v17 = vadd.f32 %v2307_v31, %v2306_v16 }
 0x244   :  { %v2293_v38 = vadd.f32 %v2292_v59, %v2291_v57  ;;  %v2309_v29 = vrot.slane %v2308_v17, 1 }
 0x246   :  { %v2294_v56 = vmul.f32 0.027777778, %v2293_v38  ;;  %v2310_v10 = vadd.f32 %v2309_v29, %v2308_v17 }
 0x248   :  { %v2311_v25 = vmul.f32 0.027777778, %v2310_v10  ;;  %v2312_v19 = vmul.f32 %v2294_v56, %v2294_v56  ;;  %v2315_v62 = vsub.f32 %v2260_v21, %v2294_v56  ;;  %v2316_v63 = vsub.f32 %v2265_v18, %v2294_v56  ;;  %v3728_v21 = vld [vmem:[%s6374_s7] ss:$0 sm:$0xff] }
 0x249   :  { %v2317_v42 = vsub.f32 %v2270_v36, %v2294_v56  ;;  %v2318_v33 = vsub.f32 %v2275_v46, %v2294_v56  ;;  %v2319_v47 = vsub.f32 %v2280_v6, %v2294_v56  ;;  %v6098_v36 = vld [vmem:[%s6372_s8 + $0x230] sm:$0xff]  ;;  %v6113_v46 = vld [vmem:[%s6372_s8 + $0x248] sm:$0xff] }
 0x24a   :  { %v2313_v3 = vsub.f32 %v2311_v25, %v2312_v19  ;;  %v4548_v49 = vpack.c.bf16 %v6103_v26, %v6098_v36  ;;  %v4551_v8 = vpack.c.bf16 %v6113_v46, %v6108_v40 }
 0x24c   :  { %v2314_v41 = vmax.f32 %v2313_v3, 0.0 }
 0x24e   :  { %v2320_v12 = vadd.f32 1e-05, %v2314_v41 }
 0x250   :  { %4567 = vrsqrt.f32 %v2320_v12 }
 0x25a   :  { %v4568_v13 = vpop.eup %4567 }
 0x25b   :  { %v2322_v35 = vmul.f32 %v4568_v13, %v2315_v62  ;;  %v2323_v37 = vmul.f32 %v4568_v13, %v2316_v63  ;;  %v2324_v53 = vmul.f32 %v4568_v13, %v2317_v42  ;;  %v2325_v0 = vmul.f32 %v4568_v13, %v2318_v33 }
 0x25c   :  { %v2326_v58 = vmul.f32 %v4568_v13, %v2319_v47 }
 0x25d   :  { %v2334_v43 = vmul.f32 %v3727_v50, %v2322_v35  ;;  %v2335_v15 = vmul.f32 %v3727_v50, %v2323_v37  ;;  %v2336_v18 = vmul.f32 %v3727_v50, %v2324_v53  ;;  %v2337_v45 = vmul.f32 %v3727_v50, %v2325_v0 }
 0x25e   :  { %v2338_v22 = vmul.f32 %v3727_v50, %v2326_v58 }
 0x25f   :  { %v2346_v11 = vadd.f32 %v3728_v21, %v2334_v43  ;;  %v2347_v27 = vadd.f32 %v3728_v21, %v2335_v15  ;;  %v2348_v4 = vadd.f32 %v3728_v21, %v2336_v18  ;;  %v2349_v39 = vadd.f32 %v3728_v21, %v2337_v45 }
 0x260   :  { %v2350_v30 = vadd.f32 %v3728_v21, %v2338_v22 }
 0x261   :  { %v2351_v9 = vmax.f32 %v2346_v11, 0.0  ;;  %v2352_v24 = vmax.f32 %v2347_v27, 0.0  ;;  %v2353_v60 = vmax.f32 %v2348_v4, 0.0  ;;  %v2354_v6 = vmax.f32 %v2349_v39, 0.0 }
 0x262   :  { %v2355_v5 = vmax.f32 %v2350_v30, 0.0 }
 0x263   :  { %v2361_v48 = vcombine.high %v2351_v9, %v2351_v9  ;;  %v2378_v34 = vcombine.high %v2352_v24, %v2352_v24  ;;  %v2385_v55 = vrot.slane %v2352_v24, %v4837_v32  ;;  %v2395_v2 = vcombine.high %v2353_v60, %v2353_v60 }
 0x264   :  { %v2412_v44 = vcombine.high %v2354_v6, %v2354_v6  ;;  %v2419_v16 = vrot.slane %v2354_v6, %v4837_v32  ;;  %v2435_v57 = vrot.slane %v2355_v5, %v4837_v32  ;;  %v2368_v31 = vrot.slane %v2351_v9, %v4837_v32 }
 0x265   :  { %v2392_v59 = vrot.slane %v2378_v34, %v4837_v32  ;;  %v2393_v17 = vcombine.high %v2385_v55, %v2385_v55  ;;  %v2375_v38 = vrot.slane %v2361_v48, %v4837_v32  ;;  %v2402_v29 = vrot.slane %v2353_v60, %v4837_v32 }
 0x266   :  { %v2426_v56 = vrot.slane %v2412_v44, %v4837_v32  ;;  %v2427_v10 = vcombine.high %v2419_v16, %v2419_v16  ;;  %v2436_v25 = vcombine.high %v2435_v57, %v2435_v57  ;;  %v2376_v19 = vcombine.high %v2368_v31, %v2368_v31 }
 0x267   :  { %v2377_v62 = vcombine.high %v2375_v38, %v2375_v38  ;;  %v2437_v63 = vcombine.low %v2368_v31, %v2368_v31  ;;  %v2455_v42 = vcombine.low %v2393_v17, %v2392_v59  ;;  %v2394_v33 = vcombine.high %v2392_v59, %v2392_v59 }
 0x268   :  { %v2428_v47 = vcombine.high %v2426_v56, %v2426_v56  ;;  %v2496_v3 = vcombine.low %v2419_v16, %v2427_v10  ;;  %v2513_v41 = vcombine.low %v2435_v57, %v2436_v25  ;;  %v2438_v12 = vcombine.low %v2376_v19, %v2375_v38 }
 0x269   :  { %v2445_v13 = vrot.slane %v2437_v63, %v4837_v32  ;;  %v2454_v50 = vcombine.low %v2377_v62, %v2385_v55  ;;  %v2469_v35 = vrot.slane %v2455_v42, %v4837_v32  ;;  %v2471_v37 = vcombine.low %v2394_v33, %v2402_v29 }
 0x26a   :  { %v2497_v53 = vcombine.low %v2426_v56, %v2428_v47  ;;  %v2520_v0 = vrot.slane %v2513_v41, %v4837_v32  ;;  %v2452_v58 = vrot.slane %v2438_v12, %v4837_v32  ;;  %v2409_v21 = vrot.slane %v2395_v2, %v4837_v32 }
 0x26b   :  { %v2462_v43 = vrot.slane %v2454_v50, %v4837_v32  ;;  %v2478_v15 = vrot.slane %v2471_v37, %v4837_v32  ;;  %v3729_v18 = vcombine.high %v2402_v29, %v2402_v29  ;;  %v6141_v45 = vrot.slane %v2496_v3, %v4837_v32 }
 0x26c   :  { %v6144_v22 = vsel %vm673_vm4, %v2520_v0, 0.0  ;;  %v2453_v11 = vcombine.low %v2445_v13, %v2452_v58  ;;  %v2411_v27 = vcombine.high %v2409_v21, %v2409_v21  ;;  %v2511_v4 = vrot.slane %v2497_v53, %v4837_v32 }
 0x26d   :  { %v6147_v39 = vcombine.low %v2462_v43, %v2469_v35  ;;  %v6150_v30 = vsel %vm673_vm4, %v2478_v15, 0.0  ;;  %v2487_v9 = vrot.slane %v3729_v18, %v4837_v32  ;;  %v2541_v24 = vrot.slane %v6144_v22, 1 }
 0x26e   :  { %v6155_v60 = vsel %vm656_vm0, 0.0, %v2453_v11  ;;  %v2536_v6 = vrot.slane %v6150_v30, 1  ;;  %v2546_v5 = vrot.slane %v6150_v30, 2  ;;  %v2556_v48 = vrot.slane %v6150_v30, 3 }
 0x26f   :  { %v2533_v34 = vrot.slane %v6155_v60, 1  ;;  %v2534_v55 = vrot.slane %v6147_v39, 1  ;;  %v2543_v2 = vrot.slane %v6155_v60, 2  ;;  %v2544_v44 = vrot.slane %v6147_v39, 2 }
 0x270   :  { %v2553_v16 = vrot.slane %v6155_v60, 3  ;;  %v2554_v57 = vrot.slane %v6147_v39, 3  ;;  %v2480_v31 = vcombine.low %v2409_v21, %v2411_v27  ;;  %v6167_v59 = vcombine.low %v6141_v45, %v2511_v4 }
 0x271   :  { %v2535_v17 = vsel %vm680_vm1, %v2533_v34, %v2534_v55  ;;  %v2545_v38 = vsel %vm691_vm2, %v2543_v2, %v2544_v44  ;;  %v2537_v29 = vsel %vm680_vm1, %v2534_v55, %v2536_v6  ;;  %v2547_v56 = vsel %vm691_vm2, %v2544_v44, %v2546_v5 }
 0x272   :  { %v2573_v10 = vcombine.low %v6155_v60, %v2535_v17  ;;  %v2574_v25 = vcombine.high %v6155_v60, %v2535_v17  ;;  %v2555_v19 = vsel %vm702_vm3, %v2553_v16, %v2554_v57  ;;  %v3730_v62 = vcombine.low %v2462_v43, %v2537_v29 }
 0x273   :  { %v2575_v63 = vcombine.low %v2545_v38, %v2555_v19  ;;  %v2576_v42 = vcombine.high %v2545_v38, %v2555_v19  ;;  %v2627_v33 = vcombine.high %v6147_v39, %v2537_v29  ;;  %v2557_v47 = vsel %vm702_vm3, %v2554_v57, %v2556_v48 }
 0x274   :  { %v2583_v3 = vrot.slane %v2573_v10, %v4837_v32  ;;  %v2590_v41 = vrot.slane %v2574_v25, %v4837_v32  ;;  %v2636_v12 = vrot.slane %v3730_v62, %v4837_v32  ;;  %v2628_v13 = vcombine.low %v2547_v56, %v2557_v47 }
 0x275   :  { %v2597_v50 = vrot.slane %v2575_v63, %v4837_v32  ;;  %v2604_v35 = vrot.slane %v2576_v42, %v4837_v32  ;;  %v2643_v37 = vrot.slane %v2627_v33, %v4837_v32  ;;  %v2629_v53 = vcombine.high %v2547_v56, %v2557_v47 }
 0x276   :  { %v2930_v0 = vrot.slane %v2583_v3, %v4837_v32  ;;  %v2944_v58 = vrot.slane %v2590_v41, %v4837_v32  ;;  %v2983_v21 = vrot.slane %v2636_v12, %v4837_v32  ;;  %v2650_v43 = vrot.slane %v2628_v13, %v4837_v32 }
 0x277   :  { %v2937_v15 = vrot.slane %v2597_v50, %v4837_v32  ;;  %v2951_v18 = vrot.slane %v2604_v35, %v4837_v32  ;;  %v2997_v11 = vrot.slane %v2643_v37, %v4837_v32  ;;  %v2657_v27 = vrot.slane %v2629_v53, %v4837_v32 }
 0x278   :  { %v2952_v4 = vcombine.low %v2930_v0, %v2944_v58  ;;  %v2953_v34 = vcombine.high %v2930_v0, %v2944_v58  ;;  %v2990_v55 = vrot.slane %v2650_v43, %v4837_v32  ;;  %v2494_v2 = vrot.slane %v2480_v31, %v4837_v32 }
 0x279   :  { %v2954_v44 = vcombine.low %v2937_v15, %v2951_v18  ;;  %v2955_v16 = vcombine.high %v2937_v15, %v2951_v18  ;;  %v3006_v57 = vcombine.high %v2983_v21, %v2997_v11  ;;  %v3004_v17 = vrot.slane %v2657_v27, %v4837_v32 }
 0x27a   :  { %3247 = vmatprep.mubr.f32.mxu1 %v2953_v34  ;;  %v3005_v38 = vcombine.low %v2983_v21, %v2997_v11  ;;  %v2495_v29 = vcombine.low %v2487_v9, %v2494_v2  ;;  %v2539_v56 = vrot.slane %v6167_v59, 1  ;;  %v2549_v10 = vrot.slane %v6167_v59, 2 }
 0x27b   :  { %3337 = vmatprep.mubr.f32.mxu0 %v2955_v16  ;;  %3248 = vmatmul.mubr.f32.vlgmr.msra.gmra.mrb[22].mxu1 %v2952_v4  ;;  %v3008_v25 = vcombine.high %v2990_v55, %v3004_v17  ;;  %v3007_v19 = vcombine.low %v2990_v55, %v3004_v17  ;;  %v2559_v62 = vrot.slane %v6167_v59, 3  ;;  %v2679_v31 = vcombine.low %v6150_v30, %v2536_v6 }
 0x27c   :  { %3338 = vmatmul.mubr.f32.vlgmr.msra.gmra.mrb[32].mxu0 %v2954_v44  ;;  %4540 = vmatpush3.bf16.msra.mxu1 %v4539_v1  ;;  %v6203_v63 = vsel %vm656_vm0, 0.0, %v2495_v29  ;;  %v2680_v9 = vcombine.low %v2546_v5, %v2556_v48  ;;  %v2542_v42 = vsel %vm680_vm1, %v2539_v56, %v2541_v24  ;;  %v2551_v33 = vrot.slane %v6144_v22, 2 }
 0x27d   :  { %3252 = vmatprep.mubr.f32.mxu1 %v3006_v57  ;;  %3342 = vmatprep.mubr.f32.mxu0 %v3008_v25  ;;  %v2538_v47 = vrot.slane %v6203_v63, 1  ;;  %v2548_v6 = vrot.slane %v6203_v63, 2  ;;  %v2558_v3 = vrot.slane %v6203_v63, 3  ;;  %v2687_v20 = vrot.slane %v2679_v31, %v4837_v32 }
 0x27e   :  { %4541 = vmatprep.subr.bf16.mxu1 %v4573_v23  ;;  %v2694_v28 = vrot.slane %v2680_v9, %v4837_v32  ;;  %v2552_v1 = vsel %vm691_vm2, %v2549_v10, %v2551_v33  ;;  %v2561_v5 = vrot.slane %v6144_v22, 3  ;;  %v3731_v48 = vcombine.low %v6141_v45, %v2542_v42 }
 0x27f   :  { %3253 = vmatmul.mubr.f32.gmra.mrb[24].mxu1 %v3005_v38  ;;  %v2540_v41 = vsel %vm680_vm1, %v2538_v47, %v2539_v56  ;;  %v2550_v12 = vsel %vm691_vm2, %v2548_v6, %v2549_v10  ;;  %v2560_v13 = vsel %vm702_vm3, %v2558_v3, %v2559_v62  ;;  %v2757_v50 = vcombine.high %v6167_v59, %v2542_v42 }
 0x280   :  { %3343 = vmatmul.mubr.f32.gmra.mrb[34].mxu0 %v3007_v19  ;;  %4543 = vmatpush3.bf16.msra.mxu1 %v4542_v51  ;;  %v2703_v35 = vcombine.low %v6203_v63, %v2540_v41  ;;  %v2704_v37 = vcombine.high %v6203_v63, %v2540_v41  ;;  %v2705_v53 = vcombine.low %v2550_v12, %v2560_v13  ;;  %v2563_v45 = vrot.slane %v6155_v60, 4  ;;  %v2908_v41 = vld [vmem:[%s6372_s8 + $0x258] sm:$0xff] }
 0x281   :  { %v2706_v0 = vcombine.high %v2550_v12, %v2560_v13  ;;  %4544 = vmatprep.subr.bf16.mxu1 %v4573_v23  ;;  %v2562_v58 = vsel %vm702_vm3, %v2559_v62, %v2561_v5  ;;  %v2766_v21 = vrot.slane %v3731_v48, %v4837_v32  ;;  %v2773_v43 = vrot.slane %v2757_v50, %v4837_v32 }
 0x282   :  { %v2713_v15 = vrot.slane %v2703_v35, %v4837_v32  ;;  %v2720_v7 = vrot.slane %v2704_v37, %v4837_v32  ;;  %v2727_v61 = vrot.slane %v2705_v53, %v4837_v32  ;;  %v2758_v51 = vcombine.low %v2552_v1, %v2562_v58 }
 0x283   :  { %v2734_v18 = vrot.slane %v2706_v0, %v4837_v32  ;;  %v2759_v11 = vcombine.high %v2552_v1, %v2562_v58  ;;  %v2809_v27 = vcombine.low %v6144_v22, %v2541_v24  ;;  %v2810_v4 = vcombine.low %v2551_v33, %v2561_v5 }
 0x284   :  { %v2736_v34 = vcombine.high %v2713_v15, %v2727_v61  ;;  %v3733_v55 = vcombine.low %v2687_v20, %v2713_v15  ;;  %v3734_v2 = vcombine.low %v2694_v28, %v2727_v61  ;;  %4546 = vmatpush3.bf16.msra.mxu1 %v4545_v54  ;;  %v2780_v44 = vrot.slane %v2758_v51, %v4837_v32  ;;  %v2909_v15 = vld [vmem:[%s6372_s8 + $0x260] sm:$0xff] }
 0x285   :  { %v2737_v16 = vcombine.low %v2720_v7, %v2734_v18  ;;  %v2738_v57 = vcombine.high %v2720_v7, %v2734_v18  ;;  %v2787_v17 = vrot.slane %v2759_v11, %v4837_v32  ;;  %4547 = vmatprep.subr.bf16.mxu1 %v4573_v23  ;;  %v2817_v38 = vrot.slane %v2809_v27, %v4837_v32 }
 0x286   :  { %v3735_v29 = vcombine.low %v2736_v34, %v2720_v7  ;;  %v3036_v24 = vrot.slane %v3733_v55, %v4837_v32  ;;  %v3043_v56 = vrot.slane %v3734_v2, %v4837_v32  ;;  %v2789_v10 = vcombine.high %v2766_v21, %v2780_v44  ;;  %v2910_v7 = vld [vmem:[%s6372_s8 + $0x268] sm:$0xff] }
 0x287   :  { %v3736_v25 = vcombine.high %v2727_v61, %v2737_v16  ;;  %v3737_v19 = vcombine.low %v2738_v57, %v2766_v21  ;;  %v2788_v14 = vcombine.low %v2766_v21, %v2780_v44  ;;  %v2790_v52 = vcombine.low %v2773_v43, %v2787_v17  ;;  %v2911_v16 = vld [vmem:[%s6372_s8 + $0x270] sm:$0xff]  ;;  %v2912_v57 = vld [vmem:[%s6372_s8 + $0x278] sm:$0xff] }
 0x288   :  { %v3050_v54 = vrot.slane %v3735_v29, %v4837_v32  ;;  %v3739_v62 = vcombine.low %v2789_v10, %v2773_v43  ;;  %4549 = vmatpush3.bf16.msra.mxu1 %v4548_v49  ;;  %v2791_v31 = vcombine.high %v2773_v43, %v2787_v17  ;;  %v2824_v9 = vrot.slane %v2810_v4, %v4837_v32  ;;  %v2907_v49 = vld [vmem:[%s6372_s8 + $0x250] sm:$0xff] }
 0x289   :  { %v3057_v42 = vrot.slane %v3736_v25, %v4837_v32  ;;  %v3089_v33 = vrot.slane %v3737_v19, %v4837_v32  ;;  %v3738_v47 = vcombine.high %v2734_v18, %v2788_v14  ;;  %v3740_v6 = vcombine.high %v2780_v44, %v2790_v52  ;;  %4550 = vmatprep.subr.bf16.mxu1 %v4573_v23 }
 0x28a   :  { %v3059_v3 = vcombine.high %v3036_v24, %v3050_v54  ;;  %v3058_v20 = vcombine.low %v3036_v24, %v3050_v54  ;;  %v3103_v28 = vrot.slane %v3739_v62, %v4837_v32  ;;  %v3741_v1 = vcombine.low %v2791_v31, %v2817_v38 }
 0x28b   :  { %v3061_v5 = vcombine.high %v3043_v56, %v3057_v42  ;;  %v3060_v48 = vcombine.low %v3043_v56, %v3057_v42  ;;  %v3096_v36 = vrot.slane %v3738_v47, %v4837_v32  ;;  %v3110_v26 = vrot.slane %v3740_v6, %v4837_v32 }
 0x28c   :  { %3257 = vmatprep.mubr.f32.mxu1 %v3059_v3  ;;  %v3112_v12 = vcombine.high %v3089_v33, %v3103_v28  ;;  %v3111_v13 = vcombine.low %v3089_v33, %v3103_v28  ;;  %v3140_v50 = vrot.slane %v3741_v1, %v4837_v32  ;;  %v2825_v35 = vcombine.low %v2817_v38, %v2824_v9 }
 0x28d   :  { %3347 = vmatprep.mubr.f32.mxu0 %v3061_v5  ;;  %3258 = vmatmul.mubr.f32.gmra.mrb[26].mxu1 %v3058_v20  ;;  %v3114_v37 = vcombine.high %v3096_v36, %v3110_v26  ;;  %v3113_v53 = vcombine.low %v3096_v36, %v3110_v26  ;;  %v2564_v0 = vrot.slane %v6147_v39, 4  ;;  %v2566_v58 = vrot.slane %v6150_v30, 4 }
 0x28e   :  { %3348 = vmatmul.mubr.f32.gmra.mrb[36].mxu0 %v3060_v48  ;;  %3262 = vmatprep.mubr.f32.mxu1 %v3112_v12  ;;  %v3742_v21 = vcombine.high %v2787_v17, %v2825_v35  ;;  %v4554_v43 = vpack.c.bf16 %v2908_v41, %v2907_v49  ;;  %v2568_v61 = vrot.slane %v6203_v63, 4  ;;  %v2569_v51 = vrot.slane %v6167_v59, 4 }
 0x28f   :  { %3352 = vmatprep.mubr.f32.mxu0 %v3114_v37  ;;  %v3148_v39 = vcombine.high %v3140_v50, %v3140_v50  ;;  %4552 = vmatpush3.bf16.msra.mxu1 %v4551_v8  ;;  %v2565_v30 = vsel %vm673_vm4, %v2563_v45, %v2564_v0  ;;  %v2567_v18 = vsel %vm673_vm4, %v2564_v0, %v2566_v58  ;;  %v2571_v11 = vrot.slane %v6144_v22, 4 }
 0x290   :  { %v3147_v27 = vrot.slane %v3742_v21, %v4837_v32  ;;  %4553 = vmatprep.subr.bf16.mxu1 %v4573_v23  ;;  %v2609_v63 = vcombine.high %v2565_v30, %v2565_v30  ;;  %v2616_v59 = vrot.slane %v2565_v30, %v4837_v32  ;;  %v2662_v4 = vcombine.high %v2567_v18, %v2567_v18 }
 0x291   :  { %3263 = vmatmul.mubr.f32.gmra.mrb[28].mxu1 %v3111_v13  ;;  %v4557_v34 = vpack.c.bf16 %v2910_v7, %v2909_v15  ;;  %v2669_v40 = vrot.slane %v2567_v18, %v4837_v32  ;;  %v2570_v46 = vsel %vm673_vm4, %v2568_v61, %v2569_v51  ;;  %v2572_v8 = vsel %vm673_vm4, %v2569_v51, %v2571_v11  ;;  %v3732_v15 = vld [vmem:[%s6375_s9] ss:$0 sm:$0xff] }
 0x292   :  { %3353 = vmatmul.mubr.f32.gmra.mrb[38].mxu0 %v3113_v53  ;;  %3267 = vmatprep.mubr.f32.mxu1 %v3148_v39  ;;  %v3149_v60 = vcombine.high %v3147_v27, %v3147_v27  ;;  %v2623_v22 = vrot.slane %v2609_v63, %v4837_v32  ;;  %v2624_v45 = vcombine.high %v2616_v59, %v2616_v59  ;;  %v4575_v19 = vmov 0.0  }
 0x293   :  { %4555 = vmatpush3.bf16.msra.mxu1 %v4554_v43  ;;  %v2676_v55 = vrot.slane %v2662_v4, %v4837_v32  ;;  %v2739_v2 = vcombine.high %v2570_v46, %v2570_v46  ;;  %v2746_v44 = vrot.slane %v2570_v46, %v4837_v32  ;;  %v2702_v38 = vrot.slane %v2566_v58, %v4837_v32 }
 0x294   :  { %3357 = vmatprep.mubr.f32.mxu0 %v3149_v60  ;;  %4556 = vmatprep.subr.bf16.mxu1 %v4573_v23  ;;  %v2625_v17 = vcombine.high %v2623_v22, %v2623_v22  ;;  %v2792_v29 = vcombine.high %v2572_v8, %v2572_v8  ;;  %v2677_v24 = vcombine.high %v2669_v40, %v2669_v40 }
 0x295   :  { %3268 = vmatmul.mubr.f32.gmra.mrb[30].mxu1 %v3140_v50  ;;  %v2678_v56 = vcombine.high %v2676_v55, %v2676_v55  ;;  %v2753_v10 = vrot.slane %v2739_v2, %v4837_v32  ;;  %v2754_v25 = vcombine.high %v2746_v44, %v2746_v44  ;;  %v2956_v14 = vcombine.low %v2616_v59, %v2624_v45 }
 0x296   :  { %3358 = vmatmul.mubr.f32.gmra.mrb[40].mxu0 %v3147_v27  ;;  %4235 = vmatprep.mubr.msk.f32.mxu1 %vm4574_vm7, %v4575_v19  ;;  %v2957_v52 = vcombine.low %v2623_v22, %v2625_v17  ;;  %v3062_v54 = vcombine.low %v2702_v38, %v2746_v44  ;;  %v4560_v62 = vpack.c.bf16 %v2912_v57, %v2911_v16 }
 0x297   :  { %4558 = vmatpush3.bf16.msra.mxu1 %v4557_v34  ;;  %v3010_v31 = vcombine.low %v2676_v55, %v2678_v56  ;;  %v3063_v9 = vcombine.low %v2754_v25, %v2753_v10  ;;  %v2755_v42 = vcombine.high %v2753_v10, %v2753_v10  ;;  %v2799_v47 = vrot.slane %v2572_v8, %v4837_v32 }
 0x298   :  { %4559 = vmatprep.subr.bf16.mxu1 %v4573_v23  ;;  %v2971_v33 = vrot.slane %v2957_v52, %v4837_v32  ;;  %v2806_v6 = vrot.slane %v2792_v29, %v4837_v32  ;;  %v3009_v3 = vcombine.low %v2669_v40, %v2677_v24  ;;  %v3070_v20 = vrot.slane %v3062_v54, %v4837_v32 }
 0x299   :  { %v3077_v28 = vrot.slane %v3063_v9, %v4837_v32  ;;  %v2832_v1 = vrot.slane %v2571_v11, %v4837_v32  ;;  %v2964_v5 = vrot.slane %v2956_v14, %v4837_v32  ;;  %v2807_v48 = vcombine.high %v2799_v47, %v2799_v47 }
 0x29a   :  { %v3115_v36 = vcombine.low %v2755_v42, %v2799_v47  ;;  %v2808_v26 = vcombine.high %v2806_v6, %v2806_v6  ;;  %v3024_v23 = vrot.slane %v3010_v31, %v4837_v32  ;;  %v3017_v35 = vrot.slane %v3009_v3, %v4837_v32 }
 0x29b   :  { %4561 = vmatpush3.bf16.msra.mxu1 %v4560_v62  ;;  %v3078_v49 = vcombine.low %v3070_v20, %v3077_v28  ;;  %v2972_v41 = vcombine.low %v2964_v5, %v2971_v33  ;;  %v3116_v12 = vcombine.low %v2807_v48, %v2806_v6 }
 0x29c   :  { %v3123_v13 = vrot.slane %v3115_v36, %v4837_v32  ;;  %v3150_v50 = vcombine.low %v2808_v26, %v2832_v1  ;;  %v3025_v53 = vcombine.low %v3017_v35, %v3024_v23 }
 0x29d   :  { %v3130_v37 = vrot.slane %v3116_v12, %v4837_v32 }
 0x29e   :  { %4236 = vmatmul.mubr.f32.vlgmr.msra.gmra.mrb[32].mxu1 %v2972_v41  ;;  %v3157_v58 = vrot.slane %v3150_v50, %v4837_v32 }
 0x29f   :  { %4238 = vmatprep.mubr.msk.f32.mxu1 %vm4574_vm7, %v4575_v19  ;;  %v3131_v0 = vcombine.low %v3123_v13, %v3130_v37 }
 0x2a2   :  { %4239 = vmatmul.mubr.f32.gmra.mrb[34].mxu1 %v3025_v53 }
 0x2a3   :  { %4241 = vmatprep.mubr.msk.f32.mxu1 %vm4574_vm7, %v4575_v19 }
 0x2a6   :  { %4242 = vmatmul.mubr.f32.gmra.mrb[36].mxu1 %v3078_v49 }
 0x2a7   :  { %4244 = vmatprep.mubr.msk.f32.mxu1 %vm4574_vm7, %v4575_v19 }
 0x2aa   :  { %4245 = vmatmul.mubr.f32.gmra.mrb[38].mxu1 %v3131_v0 }
 0x2ab   :  { %4247 = vmatprep.mubr.msk.f32.mxu1 %vm4574_vm7, %v4575_v19 }
 0x2ae   :  { %4248 = vmatmul.mubr.f32.gmra.mrb[40].mxu1 %v3157_v58 }
 0x34e   :  { %v4050_v21 = vpop.f32.mrb[22].mxu1 }
 0x34f   :  { %v4097_v43 = vpop.f32.mrb[32].mxu0  ;;  %v4051_v7 = vpop.f32.mrb[23].mxu1 }
 0x350   :  { %v4052_v61 = vadd.f32 %v4051_v7, %v4050_v21  ;;  %v4098_v51 = vpop.f32.mrb[33].mxu0 }
 0x351   :  { %v4099_v39 = vadd.f32 %v4098_v51, %v4097_v43 }
 0x352   :  { %v3250_v30 = vadd.f32 %v4052_v61, %v3732_v15  ;;  %v4053_v18 = vpop.f32.mrb[24].mxu1 }
 0x353   :  { %v4100_v11 = vpop.f32.mrb[34].mxu0  ;;  %v4054_v27 = vpop.f32.mrb[25].mxu1 }
 0x354   :  { %v4055_v63 = vadd.f32 %v4054_v27, %v4053_v18  ;;  %v4101_v59 = vpop.f32.mrb[35].mxu0  ;;  %v3340_v4 = vadd.f32 %v4099_v39, %v3250_v30 }
 0x355   :  { %v4102_v34 = vadd.f32 %v4101_v59, %v4100_v11 }
 0x356   :  { %v3255_v40 = vadd.f32 %v4055_v63, %v3732_v15 }
 0x358   :  { %v3345_v46 = vadd.f32 %v4102_v34, %v3255_v40 }
 0x360   :  { %v4056_v8 = vpop.f32.mrb[26].mxu1 }
 0x361   :  { %v4103_v60 = vpop.f32.mrb[36].mxu0  ;;  %v4057_v22 = vpop.f32.mrb[27].mxu1 }
 0x362   :  { %v4058_v45 = vadd.f32 %v4057_v22, %v4056_v8  ;;  %v4104_v55 = vpop.f32.mrb[37].mxu0 }
 0x363   :  { %v4105_v2 = vadd.f32 %v4104_v55, %v4103_v60 }
 0x364   :  { %v3260_v44 = vadd.f32 %v4058_v45, %v3732_v15  ;;  %v4059_v16 = vpop.f32.mrb[28].mxu1 }
 0x365   :  { %v4106_v57 = vpop.f32.mrb[38].mxu0  ;;  %v4060_v17 = vpop.f32.mrb[29].mxu1 }
 0x366   :  { %v4061_v38 = vadd.f32 %v4060_v17, %v4059_v16  ;;  %v4107_v29 = vpop.f32.mrb[39].mxu0  ;;  %v3350_v24 = vadd.f32 %v4105_v2, %v3260_v44 }
 0x367   :  { %v4108_v56 = vadd.f32 %v4107_v29, %v4106_v57 }
 0x368   :  { %v3265_v10 = vadd.f32 %v4061_v38, %v3732_v15  ;;  %v4062_v25 = vpop.f32.mrb[30].mxu1 }
 0x369   :  { %v4109_v19 = vpop.f32.mrb[40].mxu0  ;;  %v4063_v14 = vpop.f32.mrb[31].mxu1 }
 0x36a   :  { %v4064_v52 = vadd.f32 %v4063_v14, %v4062_v25  ;;  %v4110_v54 = vpop.f32.mrb[41].mxu0  ;;  %v3355_v62 = vadd.f32 %v4108_v56, %v3265_v10  ;;  %v3743_v25 = vld [vmem:[%s6376_s10] ss:$0 sm:$0xff] }
 0x36b   :  { %v4111_v31 = vadd.f32 %v4110_v54, %v4109_v19 }
 0x36c   :  { %v3270_v9 = vadd.f32 %v4064_v52, %v3732_v15 }
 0x36e   :  { %v3360_v42 = vadd.f32 %v4111_v31, %v3270_v9  ;;  %v3744_v31 = vld [vmem:[%s6377_s11] ss:$0 sm:$0xff] }
 0x371   :  { %v3429_v33 = vpop.f32.mrb[32].mxu1 }
 0x372   :  { %v3430_v47 = vadd.f32 %v3429_v33, %v3340_v4  ;;  %v4237_v6 = vpop.f32.mrb[33].mxu1 }
 0x374   :  { %v3465_v1 = vmul.f32 %v3430_v47, %v3430_v47 }
 0x375   :  { %v3434_v3 = vpop.f32.mrb[34].mxu1 }
 0x376   :  { %v3435_v20 = vadd.f32 %v3434_v3, %v3345_v46  ;;  %v4240_v28 = vpop.f32.mrb[35].mxu1 }
 0x378   :  { %v3453_v5 = vadd.f32 %v3435_v20, %v3430_v47  ;;  %v3466_v48 = vmul.f32 %v3435_v20, %v3435_v20 }
 0x379   :  { %v3439_v36 = vpop.f32.mrb[36].mxu1 }
 0x37a   :  { %v3470_v26 = vadd.f32 %v3466_v48, %v3465_v1  ;;  %v3440_v23 = vadd.f32 %v3439_v36, %v3350_v24  ;;  %v4243_v49 = vpop.f32.mrb[37].mxu1 }
 0x37c   :  { %v3454_v41 = vadd.f32 %v3453_v5, %v3440_v23  ;;  %v3467_v12 = vmul.f32 %v3440_v23, %v3440_v23 }
 0x37d   :  { %v3444_v13 = vpop.f32.mrb[38].mxu1 }
 0x37e   :  { %v3471_v50 = vadd.f32 %v3470_v26, %v3467_v12  ;;  %v3445_v35 = vadd.f32 %v3444_v13, %v3355_v62  ;;  %v4246_v37 = vpop.f32.mrb[39].mxu1 }
 0x380   :  { %v3455_v53 = vadd.f32 %v3454_v41, %v3445_v35  ;;  %v3468_v0 = vmul.f32 %v3445_v35, %v3445_v35 }
 0x381   :  { %v3449_v58 = vpop.f32.mrb[40].mxu1 }
 0x382   :  { %v3472_v21 = vadd.f32 %v3471_v50, %v3468_v0  ;;  %v3450_v43 = vadd.f32 %v3449_v58, %v3360_v42  ;;  %v4249_v15 = vpop.f32.mrb[41].mxu1 }
 0x384   :  { %v3456_v7 = vsel %vm673_vm4, %v3450_v43, 0.0  ;;  %v3469_v61 = vmul.f32 %v3450_v43, %v3450_v43 }
 0x385   :  { %v3457_v51 = vadd.f32 %v3456_v7, %v3455_v53 }
 0x386   :  { %v3473_v39 = vsel %vm673_vm4, %v3469_v61, 0.0 }
 0x387   :  { %v3458_v30 = vrot.slane %v3457_v51, 4  ;;  %v3474_v18 = vadd.f32 %v3473_v39, %v3472_v21 }
 0x389   :  { %v3459_v11 = vadd.f32 %v3458_v30, %v3457_v51  ;;  %v3475_v27 = vrot.slane %v3474_v18, 4 }
 0x38b   :  { %v3460_v63 = vrot.slane %v3459_v11, 2  ;;  %v3476_v59 = vadd.f32 %v3475_v27, %v3474_v18 }
 0x38d   :  { %v3461_v4 = vadd.f32 %v3460_v63, %v3459_v11  ;;  %v3477_v34 = vrot.slane %v3476_v59, 2 }
 0x38f   :  { %v3462_v40 = vrot.slane %v3461_v4, 1  ;;  %v3478_v46 = vadd.f32 %v3477_v34, %v3476_v59 }
 0x391   :  { %v3463_v8 = vadd.f32 %v3462_v40, %v3461_v4  ;;  %v3479_v60 = vrot.slane %v3478_v46, 1 }
 0x393   :  { %v3464_v22 = vmul.f32 0.027777778, %v3463_v8  ;;  %v3480_v45 = vadd.f32 %v3479_v60, %v3478_v46 }
 0x395   :  { %v3481_v55 = vmul.f32 0.027777778, %v3480_v45  ;;  %v3482_v2 = vmul.f32 %v3464_v22, %v3464_v22  ;;  %v3485_v44 = vsub.f32 %v3430_v47, %v3464_v22  ;;  %v3486_v16 = vsub.f32 %v3435_v20, %v3464_v22 }
 0x396   :  { %v3487_v57 = vsub.f32 %v3440_v23, %v3464_v22  ;;  %v3488_v17 = vsub.f32 %v3445_v35, %v3464_v22  ;;  %v3489_v38 = vsub.f32 %v3450_v43, %v3464_v22 }
 0x397   :  { %v3483_v29 = vsub.f32 %v3481_v55, %v3482_v2 }
 0x399   :  { %v3484_v24 = vmax.f32 %v3483_v29, 0.0 }
 0x39b   :  { %v3490_v56 = vadd.f32 1e-05, %v3484_v24 }
 0x39d   :  { %4569 = vrsqrt.f32 %v3490_v56 }
 0x3a7   :  { %v4570_v10 = vpop.eup %4569 }
 0x3a8   :  { %v3492_v19 = vmul.f32 %v4570_v10, %v3485_v44  ;;  %v3493_v14 = vmul.f32 %v4570_v10, %v3486_v16  ;;  %v3494_v52 = vmul.f32 %v4570_v10, %v3487_v57  ;;  %v3495_v54 = vmul.f32 %v4570_v10, %v3488_v17 }
 0x3a9   :  { %v3496_v62 = vmul.f32 %v4570_v10, %v3489_v38 }
 0x3aa   :  { %v3504_v9 = vmul.f32 %v3743_v25, %v3492_v19  ;;  %v3505_v42 = vmul.f32 %v3743_v25, %v3493_v14  ;;  %v3506_v33 = vmul.f32 %v3743_v25, %v3494_v52  ;;  %v3507_v47 = vmul.f32 %v3743_v25, %v3495_v54 }
 0x3ab   :  { %v3508_v6 = vmul.f32 %v3743_v25, %v3496_v62 }
 0x3ac   :  { %v3516_v3 = vadd.f32 %v3744_v31, %v3504_v9  ;;  %v3517_v20 = vadd.f32 %v3744_v31, %v3505_v42  ;;  %v3518_v28 = vadd.f32 %v3744_v31, %v3506_v33  ;;  %v3519_v1 = vadd.f32 %v3744_v31, %v3507_v47 }
 0x3ad   :  { %v3520_v5 = vadd.f32 %v3744_v31, %v3508_v6 }
 0x3ae   :  { %v3521_v48 = vmax.f32 %v3516_v3, 0.0  ;;  %v3522_v36 = vmax.f32 %v3517_v20, 0.0  ;;  %v3523_v26 = vmax.f32 %v3518_v28, 0.0  ;;  %v3524_v23 = vmax.f32 %v3519_v1, 0.0 }
 0x3af   :  { %v3525_v49 = vmax.f32 %v3520_v5, 0.0 }
 0x3b0   :  { %v3531_v41 = vcombine.high %v3521_v48, %v3521_v48  ;;  %v3538_v12 = vrot.slane %v3521_v48, %v4837_v32  ;;  %v3548_v13 = vcombine.high %v3522_v36, %v3522_v36  ;;  %v3555_v50 = vrot.slane %v3522_v36, %v4837_v32 }
 0x3b1   :  { %v3565_v35 = vcombine.high %v3523_v26, %v3523_v26  ;;  %v3572_v37 = vrot.slane %v3523_v26, %v4837_v32  ;;  %v3582_v53 = vcombine.high %v3524_v23, %v3524_v23  ;;  %v3589_v0 = vrot.slane %v3524_v23, %v4837_v32 }
 0x3b2   :  { %v3545_v58 = vrot.slane %v3531_v41, %v4837_v32  ;;  %v3546_v21 = vcombine.high %v3538_v12, %v3538_v12  ;;  %v3562_v43 = vrot.slane %v3548_v13, %v4837_v32  ;;  %v3563_v15 = vcombine.high %v3555_v50, %v3555_v50 }
 0x3b3   :  { %v3579_v7 = vrot.slane %v3565_v35, %v4837_v32  ;;  %v3580_v61 = vcombine.high %v3572_v37, %v3572_v37  ;;  %v3596_v51 = vrot.slane %v3582_v53, %v4837_v32  ;;  %v3597_v39 = vcombine.high %v3589_v0, %v3589_v0  ;;  %3745 = vst.sshfl [vmem:[%s6378_s12 + $0x10] sm:$0x3 pattern:$0x76325410] %v3572_v37 }
 0x3b4   :  { %v3547_v30 = vcombine.high %v3545_v58, %v3545_v58  ;;  %v3564_v18 = vcombine.high %v3562_v43, %v3562_v43  ;;  %v3605_v11 = vrot.slane %v3525_v49, %v4837_v32  ;;  %v3607_v27 = vcombine.low %v3538_v12, %v3546_v21 }
 0x3b5   :  { %v3581_v63 = vcombine.high %v3579_v7, %v3579_v7  ;;  %v3598_v59 = vcombine.high %v3596_v51, %v3596_v51  ;;  %v3624_v4 = vcombine.low %v3555_v50, %v3563_v15  ;;  %v3648_v34 = vcombine.low %v3580_v61, %v3579_v7 }
 0x3b6   :  { %v3606_v40 = vcombine.high %v3605_v11, %v3605_v11  ;;  %v3608_v46 = vcombine.low %v3545_v58, %v3547_v30  ;;  %v3625_v8 = vcombine.low %v3562_v43, %v3564_v18  ;;  %v3615_v60 = vrot.slane %v3607_v27, %v4837_v32 }
 0x3b7   :  { %v3649_v22 = vcombine.low %v3581_v63, %v3589_v0  ;;  %v3665_v45 = vcombine.low %v3597_v39, %v3596_v51  ;;  %v3632_v2 = vrot.slane %v3624_v4, %v4837_v32  ;;  %v3666_v16 = vcombine.low %v3598_v59, %v3605_v11 }
 0x3b8   :  { %v3622_v55 = vrot.slane %v3608_v46, %v4837_v32  ;;  %v3639_v44 = vrot.slane %v3625_v8, %v4837_v32  ;;  %3746 = vst.sshfl [vmem:[%s6378_s12 + $0x28] sm:$0x3 pattern:$0x76325410] %v3606_v40  ;;  %v3656_v57 = vrot.slane %v3648_v34, %v4837_v32 }
 0x3b9   :  { %v3663_v17 = vrot.slane %v3649_v22, %v4837_v32  ;;  %v3673_v24 = vrot.slane %v3665_v45, %v4837_v32  ;;  %v3680_v56 = vrot.slane %v3666_v16, %v4837_v32 }
 0x3ba   :  { %v3623_v38 = vcombine.low %v3615_v60, %v3622_v55  ;;  %v3640_v29 = vcombine.low %v3632_v2, %v3639_v44 }
 0x3bb   :  { %v3664_v10 = vcombine.low %v3656_v57, %v3663_v17  ;;  %v3681_v25 = vcombine.low %v3673_v24, %v3680_v56 }
 0x3bc   :  { %3695 = vst [vmem:[%s6378_s12] sm:$0xff] %v3623_v38  ;;  %3696 = vst [vmem:[%s6378_s12 + $0x8] sm:$0xff] %v3640_v29 }
 0x3bd   :  { %3698 = vst [vmem:[%s6378_s12 + $0x18] sm:$0xff] %v3664_v10  ;;  %3699 = vst [vmem:[%s6378_s12 + $0x20] sm:$0xff] %v3681_v25 }

</bundles_post_ra>
